<compile_context>
chip_gen: v7x
topology: tpu7x:2x2x1
jax: 0.10.0
libtpu: 0.0.40
codegen_flags: <defaults>
</compile_context>

<pallas_src>
import functools

import jax
import jax.numpy as jnp
import numpy as np
from jax.experimental import pallas as pl
from jax.experimental.pallas import tpu as pltpu


# (tap parity, x offset) combos a 3x3 conv row/col index can hit on a 2x image.
_COMBOS = ((1, -1), (0, 0), (1, 0), (0, 1))
# output parity p -> conv index d -> combo index
_PMAP = ((0, 1, 2), (1, 2, 3))


def _selector():
    # sel[offset+1, tap_parity, out_parity, conv_idx] = 1 iff that conv tap of
    # that output parity reads the given sub-pixel tap at the given offset.
    sel = np.zeros((3, 2, 2, 3), np.float32)
    for p in range(2):
        for d in range(3):
            par, off = _COMBOS[_PMAP[p][d]]
            sel[off + 1, par, p, d] = 1.0
    return sel


# ----------------------------- fused Pallas kernel ---------------------------


def _fused_kernel(xp_ref, w_ref, bc_ref, o_ref, *, rs):
    # xp_ref: (XROWS, CP)   bf16  zero-padded low-res strip (+1-row halo,
    #                             +bias-indicator channel, +zero channel pad)
    # w_ref : (9, CP, 4C)   bf16  composed (ConvTranspose o 3x3 conv) weights,
    #                             one (CP, 4C) block per low-res spatial shift
    # bc_ref: (1, 4C)       f32   Conv2d bias tiled over the 4 output parities
    # o_ref : (TH*RS, 4C)   f32   column block (p*2+q) = sub-pixel parity (p,q);
    #                             rows with (row % RS) >= W are pad columns and
    #                             are dropped by the wrapper.
    rows = o_ref.shape[0]
    acc = jnp.zeros(o_ref.shape, jnp.float32)
    for ai in range(3):                 # static unroll over the 9 shifts
        for bi in range(3):
            off = ai * rs + bi
            win = xp_ref[off:off + rows, :]      # contiguous slab, no reshape
            acc = acc + jnp.dot(win, w_ref[ai * 3 + bi],
                                preferred_element_type=jnp.float32)
    o_ref[...] = (acc + bc_ref[...]).astype(o_ref.dtype)


# ---------------------------------- wrapper ----------------------------------


@functools.partial(jax.jit, static_argnames=("strip_rows",))
def upsample_block(x_nchw, wt, bt, wc, bc, *, strip_rows=None):
    """x_nchw: (N, C, H, W).
    wt: (C_in, C_out, 2, 2) ConvTranspose2d weight, bt: (C,).
    wc: (C_out, C_in, 3, 3) Conv2d weight, bc: (C,).
    Returns (N, C, 2H, 2W) — same semantics as UpSampleBlock.forward."""
    N, C, H, W = x_nchw.shape
    C4 = 4 * C
    CP = ((C + 1 + 7) // 8) * 8            # input channels + bias indicator, padded
    RS = ((W + 2 + 7) // 8) * 8            # flat row stride (>= W + 2, 8-aligned)

    if strip_rows is None:
        strip_rows = 32
    TH = max(1, min(int(strip_rows), H))
    while H % TH:                           # strip height must divide H
        TH -= 1
    S = H // TH
    XROWS = (TH + 2) * RS + 8               # +8 zero slack rows for (ai=2, bi>0)

    # ---- combined weights (tiny, wrapper-side, f32 math then bf16 cast) -----
    sel = _selector()                                              # numpy const
    wct = jnp.transpose(wc, (2, 3, 1, 0)).astype(jnp.float32)      # (di,dj,ci,co)
    m9 = jnp.einsum('ahpi,bkqj,ijmo->abhkmpqo', sel, sel, wct)
    m9 = m9.reshape(9, C4, C4)
    # ConvTranspose taps concatenated along lanes: col (kh*2+kw)*C + co.
    wt_cat = jnp.transpose(wt, (0, 2, 3, 1)).reshape(C, C4).astype(jnp.float32)
    wt_ext = jnp.concatenate(
        [wt_cat,
         jnp.tile(bt, 4).reshape(1, C4).astype(jnp.float32),        # bias row
         jnp.zeros((CP - C - 1, C4), jnp.float32)], axis=0)         # channel pad
    m9t = jnp.einsum('kt,wto->wko', wt_ext, m9).astype(jnp.bfloat16)  # (9,CP,4C)
    bc4 = jnp.tile(bc, 4).reshape(1, C4).astype(jnp.float32)

    # ---- padded, strip-haloed, flat-rowstride input --------------------------
    x = jnp.transpose(x_nchw, (0, 2, 3, 1))                          # NHWC
    xi = jnp.concatenate(
        [x, jnp.ones((N, H, W, 1), x.dtype),                         # indicator
         jnp.zeros((N, H, W, CP - C - 1), x.dtype)], axis=-1)        # channel pad
    xp = jnp.pad(xi, ((0, 0), (1, 1), (1, RS - W - 1), (0, 0)))      # (N,H+2,RS,CP)
    ridx = jnp.arange(S)[:, None] * TH + jnp.arange(TH + 2)[None, :]  # (S, TH+2)
    xp = xp[:, ridx].reshape(N, S, (TH + 2) * RS, CP)                # halo strips
    xp = jnp.pad(xp, ((0, 0), (0, 0), (0, 8), (0, 0))).astype(jnp.bfloat16)

    flops = 2 * N * S * 9 * (TH * RS) * CP * C4
    bytes_accessed = (xp.size * 2 + m9t.size * 2 + bc4.size * 4
                      + N * S * TH * RS * C4 * 4)

    out = pl.pallas_call(
        functools.partial(_fused_kernel, rs=RS),
        out_shape=jax.ShapeDtypeStruct((N, S, TH * RS, C4), jnp.float32),
        grid_spec=pltpu.PrefetchScalarGridSpec(
            num_scalar_prefetch=0,
            grid=(N, S),
            in_specs=[
                pl.BlockSpec((None, None, XROWS, CP), lambda n, s: (n, s, 0, 0)),
                # TODO(synk): single-buffer these constant-index weight inputs
                # (pipeline_mode=pl.Buffered(1)) to free VMEM at production C.
                pl.BlockSpec((9, CP, C4), lambda n, s: (0, 0, 0)),
                pl.BlockSpec((1, C4), lambda n, s: (0, 0)),
            ],
            out_specs=pl.BlockSpec((None, None, TH * RS, C4),
                                   lambda n, s: (n, s, 0, 0)),
        ),
        compiler_params=pltpu.CompilerParams(
            dimension_semantics=("parallel", "parallel"),
            vmem_limit_bytes=64 * 1024 * 1024),
        cost_estimate=pl.CostEstimate(flops=flops, transcendentals=0,
                                      bytes_accessed=bytes_accessed),
    )(xp, m9t, bc4)

    # Single layout pass: drop pad columns, sub-pixel interleave, NHWC -> NCHW.
    z = out.reshape(N, S, TH, RS, 2, 2, C).reshape(N, H, RS, 2, 2, C)[:, :, :W]
    z = jnp.transpose(z, (0, 5, 1, 3, 2, 4))     # (n, c, i, p, j, q)
    return z.reshape(N, C, 2 * H, 2 * W)


# ------------------------------ pure-JAX reference ---------------------------


def ref_forward(x_nchw, wt, bt, wc, bc):
    # ConvTranspose2d(k=2, s=2, p=0) == conv_general_dilated with lhs_dilation=2,
    # padding 1, and the spatially-flipped, in/out-swapped kernel.
    rhs_t = jnp.flip(jnp.transpose(wt, (1, 0, 2, 3)), (2, 3))
    y = jax.lax.conv_general_dilated(
        x_nchw, rhs_t, window_strides=(1, 1), padding=((1, 1), (1, 1)),
        lhs_dilation=(2, 2), dimension_numbers=("NCHW", "OIHW", "NCHW"))
    y = y + bt[None, :, None, None]
    z = jax.lax.conv_general_dilated(
        y, wc, window_strides=(1, 1), padding=((1, 1), (1, 1)),
        dimension_numbers=("NCHW", "OIHW", "NCHW"))
    return z + bc[None, :, None, None]


# ------------------------------------ main ------------------------------------

if __name__ == "__main__":
    N, C, H, W = 2, 4, 16, 16

    key = jax.random.PRNGKey(0)
    k_x, k_wt, k_bt, k_wc, k_bc = jax.random.split(key, 5)

    x = jax.random.normal(k_x, (N, C, H, W), dtype=jnp.float32)
    # nn.ConvTranspose2d(C, C, 2, 2): weight (C_in, C_out, 2, 2), bias (C,)
    wt = 0.1 * jax.random.normal(k_wt, (C, C, 2, 2), dtype=jnp.float32)
    bt = 0.1 * jax.random.normal(k_bt, (C,), dtype=jnp.float32)
    # nn.Conv2d(C, C, 3, 1, 1): weight (C_out, C_in, 3, 3), bias (C,)
    wc = 0.1 * jax.random.normal(k_wc, (C, C, 3, 3), dtype=jnp.float32)
    bc = 0.1 * jax.random.normal(k_bc, (C,), dtype=jnp.float32)

    # strip_rows=8 -> 2 row strips per image, grid = (N, S) = (2, 2).
    out = jax.block_until_ready(
        upsample_block(x, wt, bt, wc, bc, strip_rows=8))
    assert out.shape == (N, C, 2 * H, 2 * W), out.shape

    ref = jax.block_until_ready(ref_forward(x, wt, bt, wc, bc))
    # bf16 operands + f32 accumulation -> loosened tolerance vs. the f32 ref.
    max_err = float(jnp.max(jnp.abs(out - ref)))
    assert jnp.allclose(out, ref, rtol=2e-2, atol=2e-2), max_err

    print("KERNEL_OK")
</pallas_src>

<mosaic_0001>
module attributes {stable_mosaic.version = 11 : i64} {
  func.func @_fused_kernel(%arg0: i32, %arg1: i32, %arg2: memref<1x1x248x8xbf16, #tpu.memory_space<vmem>>, %arg3: memref<9x8x16xbf16, #tpu.memory_space<vmem>>, %arg4: memref<1x16xf32, #tpu.memory_space<vmem>>, %arg5: memref<1x1x192x16xf32, #tpu.memory_space<vmem>>) attributes {dimension_semantics = [#tpu.dimension_semantics<parallel>, #tpu.dimension_semantics<parallel>], iteration_bounds = array<i64: 2, 2>, scalar_prefetch = 0 : i64, scratch_operands = 0 : i64, tpu.core_type = #tpu.core_type<tc>, window_params = [{transform_indices = @transform_0, window_bounds = array<i64: 1, 1, 248, 8>}, {pipeline_mode = #tpu.pipeline_mode<synchronous>, transform_indices = @transform_1, window_bounds = array<i64: 9, 8, 16>}, {pipeline_mode = #tpu.pipeline_mode<synchronous>, transform_indices = @transform_2, window_bounds = array<i64: 1, 16>}, {transform_indices = @transform_3, window_bounds = array<i64: 1, 1, 192, 16>}]} {
    %cst = arith.constant 0.000000e+00 : f32
    %0 = vector.broadcast %cst : f32 to vector<192x16xf32>
    %c0 = arith.constant 0 : index
    %c0_0 = arith.constant 0 : index
    %c0_1 = arith.constant 0 : index
    %c0_2 = arith.constant 0 : index
    %1 = vector.load %arg2[%c0, %c0_0, %c0_1, %c0_2] : memref<1x1x248x8xbf16, #tpu.memory_space<vmem>>, vector<1x1x192x8xbf16>
    %2 = vector.shape_cast %1 : vector<1x1x192x8xbf16> to vector<192x8xbf16>
    %c0_3 = arith.constant 0 : index
    %c0_4 = arith.constant 0 : index
    %c0_5 = arith.constant 0 : index
    %3 = vector.load %arg3[%c0_3, %c0_4, %c0_5] : memref<9x8x16xbf16, #tpu.memory_space<vmem>>, vector<1x8x16xbf16>
    %4 = vector.shape_cast %3 : vector<1x8x16xbf16> to vector<8x16xbf16>
    %cst_6 = arith.constant dense<0.000000e+00> : vector<192x16xf32>
    %5 = tpu.matmul %2, %4, %cst_6 {dimension_numbers = #tpu.dot_dimension_numbers<[1], [0], [0], [1], [0, 0, 1, 1], [], []>} : vector<192x8xbf16>, vector<8x16xbf16>, vector<192x16xf32> -> vector<192x16xf32>
    %6 = arith.addf %0, %5 : vector<192x16xf32>
    %c0_7 = arith.constant 0 : index
    %c0_8 = arith.constant 0 : index
    %c1 = arith.constant 1 : index
    %c0_9 = arith.constant 0 : index
    %7 = vector.load %arg2[%c0_7, %c0_8, %c1, %c0_9] : memref<1x1x248x8xbf16, #tpu.memory_space<vmem>>, vector<1x1x192x8xbf16>
    %8 = vector.shape_cast %7 : vector<1x1x192x8xbf16> to vector<192x8xbf16>
    %c1_10 = arith.constant 1 : index
    %c0_11 = arith.constant 0 : index
    %c0_12 = arith.constant 0 : index
    %9 = vector.load %arg3[%c1_10, %c0_11, %c0_12] : memref<9x8x16xbf16, #tpu.memory_space<vmem>>, vector<1x8x16xbf16>
    %10 = vector.shape_cast %9 : vector<1x8x16xbf16> to vector<8x16xbf16>
    %cst_13 = arith.constant dense<0.000000e+00> : vector<192x16xf32>
    %11 = tpu.matmul %8, %10, %cst_13 {dimension_numbers = #tpu.dot_dimension_numbers<[1], [0], [0], [1], [0, 0, 1, 1], [], []>} : vector<192x8xbf16>, vector<8x16xbf16>, vector<192x16xf32> -> vector<192x16xf32>
    %12 = arith.addf %6, %11 : vector<192x16xf32>
    %c0_14 = arith.constant 0 : index
    %c0_15 = arith.constant 0 : index
    %c2 = arith.constant 2 : index
    %c0_16 = arith.constant 0 : index
    %13 = vector.load %arg2[%c0_14, %c0_15, %c2, %c0_16] : memref<1x1x248x8xbf16, #tpu.memory_space<vmem>>, vector<1x1x192x8xbf16>
    %14 = vector.shape_cast %13 : vector<1x1x192x8xbf16> to vector<192x8xbf16>
    %c2_17 = arith.constant 2 : index
    %c0_18 = arith.constant 0 : index
    %c0_19 = arith.constant 0 : index
    %15 = vector.load %arg3[%c2_17, %c0_18, %c0_19] : memref<9x8x16xbf16, #tpu.memory_space<vmem>>, vector<1x8x16xbf16>
    %16 = vector.shape_cast %15 : vector<1x8x16xbf16> to vector<8x16xbf16>
    %cst_20 = arith.constant dense<0.000000e+00> : vector<192x16xf32>
    %17 = tpu.matmul %14, %16, %cst_20 {dimension_numbers = #tpu.dot_dimension_numbers<[1], [0], [0], [1], [0, 0, 1, 1], [], []>} : vector<192x8xbf16>, vector<8x16xbf16>, vector<192x16xf32> -> vector<192x16xf32>
    %18 = arith.addf %12, %17 : vector<192x16xf32>
    %c0_21 = arith.constant 0 : index
    %c0_22 = arith.constant 0 : index
    %c24 = arith.constant 24 : index
    %c0_23 = arith.constant 0 : index
    %19 = vector.load %arg2[%c0_21, %c0_22, %c24, %c0_23] : memref<1x1x248x8xbf16, #tpu.memory_space<vmem>>, vector<1x1x192x8xbf16>
    %20 = vector.shape_cast %19 : vector<1x1x192x8xbf16> to vector<192x8xbf16>
    %c3 = arith.constant 3 : index
    %c0_24 = arith.constant 0 : index
    %c0_25 = arith.constant 0 : index
    %21 = vector.load %arg3[%c3, %c0_24, %c0_25] : memref<9x8x16xbf16, #tpu.memory_space<vmem>>, vector<1x8x16xbf16>
    %22 = vector.shape_cast %21 : vector<1x8x16xbf16> to vector<8x16xbf16>
    %cst_26 = arith.constant dense<0.000000e+00> : vector<192x16xf32>
    %23 = tpu.matmul %20, %22, %cst_26 {dimension_numbers = #tpu.dot_dimension_numbers<[1], [0], [0], [1], [0, 0, 1, 1], [], []>} : vector<192x8xbf16>, vector<8x16xbf16>, vector<192x16xf32> -> vector<192x16xf32>
    %24 = arith.addf %18, %23 : vector<192x16xf32>
    %c0_27 = arith.constant 0 : index
    %c0_28 = arith.constant 0 : index
    %c25 = arith.constant 25 : index
    %c0_29 = arith.constant 0 : index
    %25 = vector.load %arg2[%c0_27, %c0_28, %c25, %c0_29] : memref<1x1x248x8xbf16, #tpu.memory_space<vmem>>, vector<1x1x192x8xbf16>
    %26 = vector.shape_cast %25 : vector<1x1x192x8xbf16> to vector<192x8xbf16>
    %c4 = arith.constant 4 : index
    %c0_30 = arith.constant 0 : index
    %c0_31 = arith.constant 0 : index
    %27 = vector.load %arg3[%c4, %c0_30, %c0_31] : memref<9x8x16xbf16, #tpu.memory_space<vmem>>, vector<1x8x16xbf16>
    %28 = vector.shape_cast %27 : vector<1x8x16xbf16> to vector<8x16xbf16>
    %cst_32 = arith.constant dense<0.000000e+00> : vector<192x16xf32>
    %29 = tpu.matmul %26, %28, %cst_32 {dimension_numbers = #tpu.dot_dimension_numbers<[1], [0], [0], [1], [0, 0, 1, 1], [], []>} : vector<192x8xbf16>, vector<8x16xbf16>, vector<192x16xf32> -> vector<192x16xf32>
    %30 = arith.addf %24, %29 : vector<192x16xf32>
    %c0_33 = arith.constant 0 : index
    %c0_34 = arith.constant 0 : index
    %c26 = arith.constant 26 : index
    %c0_35 = arith.constant 0 : index
    %31 = vector.load %arg2[%c0_33, %c0_34, %c26, %c0_35] : memref<1x1x248x8xbf16, #tpu.memory_space<vmem>>, vector<1x1x192x8xbf16>
    %32 = vector.shape_cast %31 : vector<1x1x192x8xbf16> to vector<192x8xbf16>
    %c5 = arith.constant 5 : index
    %c0_36 = arith.constant 0 : index
    %c0_37 = arith.constant 0 : index
    %33 = vector.load %arg3[%c5, %c0_36, %c0_37] : memref<9x8x16xbf16, #tpu.memory_space<vmem>>, vector<1x8x16xbf16>
    %34 = vector.shape_cast %33 : vector<1x8x16xbf16> to vector<8x16xbf16>
    %cst_38 = arith.constant dense<0.000000e+00> : vector<192x16xf32>
    %35 = tpu.matmul %32, %34, %cst_38 {dimension_numbers = #tpu.dot_dimension_numbers<[1], [0], [0], [1], [0, 0, 1, 1], [], []>} : vector<192x8xbf16>, vector<8x16xbf16>, vector<192x16xf32> -> vector<192x16xf32>
    %36 = arith.addf %30, %35 : vector<192x16xf32>
    %c0_39 = arith.constant 0 : index
    %c0_40 = arith.constant 0 : index
    %c48 = arith.constant 48 : index
    %c0_41 = arith.constant 0 : index
    %37 = vector.load %arg2[%c0_39, %c0_40, %c48, %c0_41] : memref<1x1x248x8xbf16, #tpu.memory_space<vmem>>, vector<1x1x192x8xbf16>
    %38 = vector.shape_cast %37 : vector<1x1x192x8xbf16> to vector<192x8xbf16>
    %c6 = arith.constant 6 : index
    %c0_42 = arith.constant 0 : index
    %c0_43 = arith.constant 0 : index
    %39 = vector.load %arg3[%c6, %c0_42, %c0_43] : memref<9x8x16xbf16, #tpu.memory_space<vmem>>, vector<1x8x16xbf16>
    %40 = vector.shape_cast %39 : vector<1x8x16xbf16> to vector<8x16xbf16>
    %cst_44 = arith.constant dense<0.000000e+00> : vector<192x16xf32>
    %41 = tpu.matmul %38, %40, %cst_44 {dimension_numbers = #tpu.dot_dimension_numbers<[1], [0], [0], [1], [0, 0, 1, 1], [], []>} : vector<192x8xbf16>, vector<8x16xbf16>, vector<192x16xf32> -> vector<192x16xf32>
    %42 = arith.addf %36, %41 : vector<192x16xf32>
    %c0_45 = arith.constant 0 : index
    %c0_46 = arith.constant 0 : index
    %c49 = arith.constant 49 : index
    %c0_47 = arith.constant 0 : index
    %43 = vector.load %arg2[%c0_45, %c0_46, %c49, %c0_47] : memref<1x1x248x8xbf16, #tpu.memory_space<vmem>>, vector<1x1x192x8xbf16>
    %44 = vector.shape_cast %43 : vector<1x1x192x8xbf16> to vector<192x8xbf16>
    %c7 = arith.constant 7 : index
    %c0_48 = arith.constant 0 : index
    %c0_49 = arith.constant 0 : index
    %45 = vector.load %arg3[%c7, %c0_48, %c0_49] : memref<9x8x16xbf16, #tpu.memory_space<vmem>>, vector<1x8x16xbf16>
    %46 = vector.shape_cast %45 : vector<1x8x16xbf16> to vector<8x16xbf16>
    %cst_50 = arith.constant dense<0.000000e+00> : vector<192x16xf32>
    %47 = tpu.matmul %44, %46, %cst_50 {dimension_numbers = #tpu.dot_dimension_numbers<[1], [0], [0], [1], [0, 0, 1, 1], [], []>} : vector<192x8xbf16>, vector<8x16xbf16>, vector<192x16xf32> -> vector<192x16xf32>
    %48 = arith.addf %42, %47 : vector<192x16xf32>
    %c0_51 = arith.constant 0 : index
    %c0_52 = arith.constant 0 : index
    %c50 = arith.constant 50 : index
    %c0_53 = arith.constant 0 : index
    %49 = vector.load %arg2[%c0_51, %c0_52, %c50, %c0_53] : memref<1x1x248x8xbf16, #tpu.memory_space<vmem>>, vector<1x1x192x8xbf16>
    %50 = vector.shape_cast %49 : vector<1x1x192x8xbf16> to vector<192x8xbf16>
    %c8 = arith.constant 8 : index
    %c0_54 = arith.constant 0 : index
    %c0_55 = arith.constant 0 : index
    %51 = vector.load %arg3[%c8, %c0_54, %c0_55] : memref<9x8x16xbf16, #tpu.memory_space<vmem>>, vector<1x8x16xbf16>
    %52 = vector.shape_cast %51 : vector<1x8x16xbf16> to vector<8x16xbf16>
    %cst_56 = arith.constant dense<0.000000e+00> : vector<192x16xf32>
    %53 = tpu.matmul %50, %52, %cst_56 {dimension_numbers = #tpu.dot_dimension_numbers<[1], [0], [0], [1], [0, 0, 1, 1], [], []>} : vector<192x8xbf16>, vector<8x16xbf16>, vector<192x16xf32> -> vector<192x16xf32>
    %54 = arith.addf %48, %53 : vector<192x16xf32>
    %c0_57 = arith.constant 0 : index
    %c0_58 = arith.constant 0 : index
    %55 = vector.load %arg4[%c0_57, %c0_58] : memref<1x16xf32, #tpu.memory_space<vmem>>, vector<1x16xf32>
    %56 = vector.broadcast %55 : vector<1x16xf32> to vector<192x16xf32>
    %57 = arith.addf %54, %56 : vector<192x16xf32>
    %c0_59 = arith.constant 0 : index
    %c0_60 = arith.constant 0 : index
    %c0_61 = arith.constant 0 : index
    %c0_62 = arith.constant 0 : index
    %58 = vector.load %arg5[%c0_59, %c0_60, %c0_61, %c0_62] : memref<1x1x192x16xf32, #tpu.memory_space<vmem>>, vector<1x1x192x16xf32>
    %59 = vector.shape_cast %58 : vector<1x1x192x16xf32> to vector<192x16xf32>
    %60 = vector.shape_cast %57 : vector<192x16xf32> to vector<1x1x192x16xf32>
    tpu.vector_store %arg5[%c0_59, %c0_60, %c0_61, %c0_62], %60 {strides = array<i32>} : memref<1x1x192x16xf32, #tpu.memory_space<vmem>>, vector<1x1x192x16xf32>,
    return
  }
  func.func @transform_0(%arg0: i32, %arg1: i32) -> (i32, i32, i32, i32) {
    %c0_i32 = arith.constant 0 : i32
    %c0_i32_0 = arith.constant 0 : i32
    %c0_i32_1 = arith.constant 0 : i32
    return %arg0, %arg1, %c0_i32, %c0_i32_0 : i32, i32, i32, i32
  }
  func.func @transform_1(%arg0: i32, %arg1: i32) -> (i32, i32, i32) {
    %c0_i32 = arith.constant 0 : i32
    %c0_i32_0 = arith.constant 0 : i32
    %c0_i32_1 = arith.constant 0 : i32
    %c0_i32_2 = arith.constant 0 : i32
    return %c0_i32, %c0_i32_0, %c0_i32_1 : i32, i32, i32
  }
  func.func @transform_2(%arg0: i32, %arg1: i32) -> (i32, i32) {
    %c0_i32 = arith.constant 0 : i32
    %c0_i32_0 = arith.constant 0 : i32
    %c0_i32_1 = arith.constant 0 : i32
    return %c0_i32, %c0_i32_0 : i32, i32
  }
  func.func @transform_3(%arg0: i32, %arg1: i32) -> (i32, i32, i32, i32) {
    %c0_i32 = arith.constant 0 : i32
    %c0_i32_0 = arith.constant 0 : i32
    %c0_i32_1 = arith.constant 0 : i32
    return %arg0, %arg1, %c0_i32, %c0_i32_0 : i32, i32, i32, i32
  }
}

</mosaic_0001>

<bundles_post_ra>
// kernel: tile.13
= control target key start
LH: loop header
LB: loop body
LE: loop exit
PB: predicated region body
PF: predicated region fallthrough
CT: control target
= control target key end

     0   :  { %v8_v1 = vmov 0.0   ;;  %s25_s0 = inlined_call_operand.vmem [shape: f32[4], index: 0, kind: input, shape index: {}]   ;;  %s26_s1 = inlined_call_operand.vmem [shape: bf16[4,4], index: 1, kind: output, shape index: {}]  }
   0x1   :  { %v4_v0 = vld [vmem:[%s25_s0] ss:$0 sm:$0xff] }
   0x2   :  { %v5_v2 = vpack.c.bf16 %v8_v1, %v4_v0 }
   0x4   :  { %6 = vst [vmem:[%s26_s1] sm:$0x3] %v5_v2 }

// kernel: tile.14
= control target key start
LH: loop header
LB: loop body
LE: loop exit
PB: predicated region body
PF: predicated region fallthrough
CT: control target
= control target key end

     0   :  { %vm19_vm0 = vcmask 31744   ;;  %s52_s8 = smov 4   ;;  %s53_s9 = smov 8   ;;  %vm25_vm1 = vcmask 130144   ;;  %vm31_vm2 = vcmask 97344   ;;  %vm37_vm3 = vcmask 64544   ;;  %s71_s0 = inlined_call_operand.vmem [shape: bf16[4,4], index: 0, kind: input, shape index: {}]   ;;  %s72_s1 = inlined_call_operand.vmem [shape: bf16[1,16], index: 1, kind: output, shape index: {}]  }
   0x1   :  { %v14_v0 = vld [vmem:[%s71_s0] sm:$0x3]  ;;  %s51_s0 = smov 12   ;;  %v54_v10 = vmov 0.0  }
   0x2   :  { %v15_v1 = vunpack.c.l.bf16 %v14_v0 }
   0x4   :  { %17 = vst [vmem:[#allocation1] sm:$0xf] %v15_v1 }
   0xb   :  { %v22_v2 = vld [vmem:[#allocation1 + $0x3] sm:$0x1]   ;;  %v34_v3 = vld [vmem:[#allocation1 + $0x1] sm:$0x1]   ;;  %v18_v4 = vld [vmem:[#allocation1] sm:$0x1]  }
   0xc   :  { %23 = vrot.lane.b32.xlu0 %v22_v2, %s51_s0  ;;  %35 = vrot.lane.b32.xlu1 %v34_v3, %s52_s8  ;;  %v28_v5 = vld [vmem:[#allocation1 + $0x2] sm:$0x1]   ;;  %20 = vst.msk [vmem:[#allocation0] sm:$0x1] %vm19_vm0, %v18_v4  }
  0x10   :  { %29 = vrot.lane.b32.xlu0 %v28_v5, %s53_s9 }
  0x7e   :  { %v24_v6 = vpop.permute.xlu0 %23   ;;  %v36_v7 = vpop.permute.xlu1 %35  }
  0x7f   :  { %26 = vst.msk [vmem:[#allocation0] sm:$0x1] %vm25_vm1, %v24_v6  }
  0x82   :  { %v30_v8 = vpop.permute.xlu0 %29  }
  0x83   :  { %32 = vst.msk [vmem:[#allocation0] sm:$0x1] %vm31_vm2, %v30_v8  }
  0x84   :  { %38 = vst.msk [vmem:[#allocation0] sm:$0x1] %vm37_vm3, %v36_v7  }
  0x8b   :  { %v43_v9 = vld [vmem:[#allocation0] sm:$0x3] }
  0x8c   :  { %v44_v11 = vpack.c.bf16 %v54_v10, %v43_v9 }
  0x8e   :  { %46 = vst [vmem:[%s72_s1] sm:$0x1] %v44_v11 }

// kernel: tile.18
= control target key start
LH: loop header
LB: loop body
LE: loop exit
PB: predicated region body
PF: predicated region fallthrough
CT: control target
= control target key end

     0   :  { %s22_s0 = inlined_call_operand.vmem [shape: f32[4], index: 0, kind: input, shape index: {}]   ;;  %s23_s1 = inlined_call_operand.vmem [shape: f32[4,4], index: 1, kind: output, shape index: {}]  }
   0x1   :  { %v4_v0 = vld [vmem:[%s22_s0] ss:$0 sm:$0xff] }
   0x2   :  { %5 = vst [vmem:[%s23_s1] sm:$0xf] %v4_v0 }

// kernel: tile.19
= control target key start
LH: loop header
LB: loop body
LE: loop exit
PB: predicated region body
PF: predicated region fallthrough
CT: control target
= control target key end

     0   :  { %s101_s0 = inlined_call_operand.vmem [shape: f32[4,4], index: 0, kind: input, shape index: {}]   ;;  %s102_s1 = inlined_call_operand.hbm [shape: f32[1,16], index: 1, kind: output, shape index: {}]  }
   0x1   :  { %v5_v0 = vld [vmem:[%s101_s0] sm:$0xf] }
   0x2   :  { %6 = vst [vmem:[#allocation3] sm:$0xf] %v5_v0 }
   0x3   :  { %2 = vsyncpa [#allocation1], 0  ;;  %vm8_vm0 = vcmask 31744   ;;  %s72_s0 = smov 12   ;;  %s73_s8 = smov 4   ;;  %vm14_vm1 = vcmask 130144  }
   0x4   :  { %s74_s9 = smov 8   ;;  %vm20_vm2 = vcmask 97344   ;;  %vm26_vm3 = vcmask 64544   ;;  %s75_s10 = smov [#allocation0]  }
   0x5   :  { %s38_s11 = sshll.u32 %s75_s10, 4  ;;  %s39_s11 = int_to_ptr.vmem [resolvable:$true] %s38_s11 }
   0x6   :  { %s48_s12 = scalar_lea.vmem %s39_s11, 16  ;;  %s52_s13 = scalar_lea.vmem %s39_s11, 32 }
   0x7   :  { %p49_p0 = scmp.ne.s32.totalorder %s39_s11, %s48_s12  ;;  %p53_p1 = scmp.lt.s32.totalorder %s39_s11, %s39_s11 }
   0x8   :  { %p54_p2 = scmp.lt.s32.totalorder %s52_s13, %s48_s12 }
   0x9   :  { %v11_v1 = vld [vmem:[#allocation3 + $0x3] sm:$0x1]   ;;  %v23_v2 = vld [vmem:[#allocation3 + $0x1] sm:$0x1]   ;;  %v7_v3 = vld [vmem:[#allocation3] sm:$0x1]  }
   0xa   :  { %12 = vrot.lane.b32.xlu0 %v11_v1, %s72_s0  ;;  %24 = vrot.lane.b32.xlu1 %v23_v2, %s73_s8  ;;  %v17_v4 = vld [vmem:[#allocation3 + $0x2] sm:$0x1]   ;;  %9 = vst.msk [vmem:[#allocation2] sm:$0x1] %vm8_vm0, %v7_v3   ;;  %p55_p3 = por %p54_p2, %p53_p1 }
   0xc   :  { %p56_p4 = pnand %p55_p3, %p49_p0 }
   0xe   :  { %18 = vrot.lane.b32.xlu0 %v17_v4, %s74_s9 }
  0x7c   :  { %v13_v5 = vpop.permute.xlu0 %12   ;;  %v25_v6 = vpop.permute.xlu1 %24  }
  0x7d   :  { %15 = vst.msk [vmem:[#allocation2] sm:$0x1] %vm14_vm1, %v13_v5  }
  0x80   :  { %v19_v7 = vpop.permute.xlu0 %18  }
  0x81   :  { %21 = vst.msk [vmem:[#allocation2] sm:$0x1] %vm20_vm2, %v19_v7  }
  0x82   :  { %27 = vst.msk [vmem:[#allocation2] sm:$0x1] %vm26_vm3, %v25_v6  }
  0x89   :  { %v31_v8 = vld [vmem:[#allocation2] sm:$0x1] }
  0x8a   :  { %33 = vst [vmem:[#allocation0] sm:$0x1] %v31_v8 }
  0x8b   :  { %59 = shalt.err (!%p56_p4)
}
  0x8c   :  { %s60_s16 = scalar_lea.hbm %s102_s1, 16 }
  0x8d   :  { %p61_p5 = scmp.ne.s32.totalorder %s102_s1, %s60_s16  ;;  %p64_p6 = scmp.lt.u32.totalorder %s60_s16, %s102_s1 }
  0x8f   :  { %p66_p7 = pnand %p64_p6, %p61_p5 }
  0x91   :  { %69 = shalt.err (!%p66_p7)
}
  0x92   :  { %41 = dma.vmem_to_hbm [thread:$0]  %s39_s11, 16, %s102_s1, [#allocation1]  }
  0x93   :  { %70 = dma.done.wait [#allocation1], 16  }
  0x94   :  { %71 = vsyncadd [#allocation1], 4294967280 }
  0x95   :  { %43 = vsyncpa [#allocation1], 1 }

// kernel: upsample_block.1
= control target key start
LH: loop header
LB: loop body
LE: loop exit
PB: predicated region body
PF: predicated region fallthrough
CT: control target
= control target key end

     0   :  { %s4946_s0 = inlined_call_operand.hbm [shape: bf16[2,2,248,8], index: 0, kind: input, shape index: {}]   ;;  %s4947_s1 = inlined_call_operand.hbm [shape: bf16[9,8,16], index: 1, kind: input, shape index: {}]   ;;  %s4948_s2 = inlined_call_operand.hbm [shape: f32[1,16], index: 2, kind: input, shape index: {}]   ;;  %s4949_s3 = inlined_call_operand.hbm [shape: f32[2,2,192,16], index: 3, kind: output, shape index: {}]  }
   0x1   :  { %4959 = sst [smem:[#allocation15_spill]] %s4947_s1 }
   0x2   :  { %4960 = sst [smem:[#allocation16_spill]] %s4948_s2 }
   0x3   :  { %8 = vsyncpa [#allocation3], 0 }
   0x4   :  { %10 = vsyncpa [#allocation3 + $0x1], 0 }
   0x5   :  { %11 = vsyncpa [#allocation6], 0 }
   0x6   :  { %12 = vsyncpa [#allocation4], 0 }
   0x7   :  { %14 = vsyncpa [#allocation4 + $0x1], 0  ;;  %s4061_s12 = smov 0   ;;  %s4063_s13 = smov 0  }
   0x8   :  { %s4065_s14 = smov 0   ;;  %s4067_s15 = smov 0  }
   0x9   :  { %s4069_s16 = smov 0   ;;  %s4071_s17 = smov 0  }
   0xa   :  { %s4073_s18 = smov 0   ;;  %s4075_s19 = smov 0  }
   0xb LB: > { %4961 = sst [smem:[#allocation12_spill]] %s4023_s17  ;;  %s2924_s20 = sadd.s32 4294967295, %s4031_s19   ;;  %s4031_s19 = sphi %s4075_s19, %s20_s19   ;;  %s4027_s18 = sphi %s4073_s18, %s4989_s18   ;;  %s4023_s17 = sphi %s4071_s17, %s4983_s17   ;;  %s4019_s16 = sphi %s4069_s16, %s4988_s16   ;;  %s4015_s15 = sphi %s4067_s15, %s4982_s15   ;;  %s4011_s14 = sphi %s4065_s14, %s4987_s14   ;;  %s4007_s13 = sphi %s4063_s13, %s4986_s13   ;;  %s4003_s12 = sphi %s4061_s12, %s4985_s12  }
   0xc   : > { %s2925_s21 = sadd.s32 4294967294, %s4031_s19   ;;  %p54_p0 = scmp.ne.s32.totalorder %s4007_s13, %s4003_s12 }
   0xd   : > { %p4105_p1 = scmp.eq.s32.totalorder %s2924_s20, 0  ;;  %p4109_p2 = scmp.eq.s32.totalorder %s2924_s20, 3 }
   0xe   : > { %p128_p3 = scmp.eq.s32.totalorder %s2925_s21, 3  ;;  %p2926_p5 = scmp.ge.s32.totalorder %s4031_s19, 1 }
   0xf   : > { %s4962_s22 = scalar_select %p4105_p1, 1, 0 }
  0x10   : > { %s4963_s23 = scalar_select %p4109_p2, 1, 0 }
  0x11   : > { %p4115_p4 = por %p4105_p1, %p54_p0  ;;  %p4120_p6 = por %p128_p3, %p54_p0 }
  0x12   : > { %p135_p7 = scmp.lt.s32.totalorder %s4031_s19, 5  ;;  %s4033_s27 = smov [#allocation5]  }
  0x13   : > { %s4964_s24 = scalar_select %p4115_p4, 1, 0 }
  0x14   : > { %s4965_s25 = scalar_select %p4120_p6, 1, 0 }
  0x15   : > { %p4125_p8 = pnand %p2926_p5, %p135_p7  ;;  %s147_s28 = sshll.u32 %s4033_s27, 4  ;;  %s148_s28 = int_to_ptr.vmem [resolvable:$true] %s147_s28 }
  0x16   : > { %s4034_s30 = smov [#allocation7]   ;;  %s4968_s1 = sld [smem:[#allocation15_spill]] }
  0x17   : > { %s4966_s26 = scalar_select %p4125_p8, 1, 0 }
  0x18   : > { %p3686_p9 = pneg %p4125_p8  ;;  %s161_s4 = sshll.u32 %s4034_s30, 4  ;;  %s4137_s4 = int_to_ptr.vmem [resolvable:$true] %s161_s4 }
  0x1a   : > { %p4133_p10 = pnand %p3686_p9, %p4105_p1 }
  0x1c   : > { %s3843_s7 = scalar_lea.hbm %s4968_s1, 576  ;;  %p3845_p12 = pneg %p4133_p10 }
  0x1d   : > { %p3844_p11 = scmp.ne.s32.totalorder %s4968_s1, %s3843_s7  ;;  %p3850_p3 = scmp.lt.u32.totalorder %s3843_s7, %s4968_s1 }
  0x1f   : > { %p3846_p13 = pnand %p3845_p12, %p3844_p11 }
  0x21   : > { %p3847_p0 = pneg %p3846_p13 }
  0x23   : > { %p3852_p5 = pnand %p3850_p3, %p3847_p0 }
  0x25   : > { %3855 = shalt.err (!%p3852_p5)
}
  0x26   : > { %s3856_s20 = scalar_lea.vmem %s148_s28, 576  ;;  %p3864_p1 = scmp.lt.s32.totalorder %s148_s28, %s148_s28 }
  0x27   : > { %p3857_p7 = scmp.ne.s32.totalorder %s148_s28, %s3856_s20  ;;  %p3865_p4 = scmp.lt.s32.totalorder %s3856_s20, %s3856_s20 }
  0x29   : > { %p3859_p9 = pnand %p3857_p7, %p3845_p12  ;;  %p3866_p8 = por %p3865_p4, %p3864_p1 }
  0x2b   : > { %p3860_p6 = pneg %p3859_p9 }
  0x2d   : > { %p3867_p2 = pnand %p3866_p8, %p3860_p6 }
  0x2f   : > { %3870 = shalt.err (!%p3867_p2)
}
  0x30   : > { %s4954_s21 = smov 64   ;;  %s4955_s27 = smov 4  }
  0x31   : > { %3689 = dma.hbm_to_vmem [thread:$0]  (!%p4133_p10), %s4968_s1, 576, %s148_s28, [#allocation6], %s4954_s21, %s4954_s21, %s4955_s27  }
  0x32   : > { %s4969_s2 = sld [smem:[#allocation16_spill]] }
  0x38   : > { %s3871_s8 = scalar_lea.hbm %s4969_s2, 16 }
  0x39   : > { %p3872_p1 = scmp.ne.s32.totalorder %s4969_s2, %s3871_s8  ;;  %p3878_p6 = scmp.lt.u32.totalorder %s3871_s8, %s4969_s2 }
  0x3b   : > { %p3874_p2 = pnand %p3872_p1, %p3845_p12 }
  0x3d   : > { %p3875_p4 = pneg %p3874_p2 }
  0x3f   : > { %p3880_p8 = pnand %p3878_p6, %p3875_p4 }
  0x41   : > { %3883 = shalt.err (!%p3880_p8)
}
  0x42   : > { %s3884_s28 = scalar_lea.vmem %s4137_s4, 16  ;;  %s3891_s30 = scalar_lea.vmem %s4137_s4, 32 }
  0x43   : > { %p3885_p11 = scmp.ne.s32.totalorder %s4137_s4, %s3884_s28  ;;  %p3892_p3 = scmp.lt.s32.totalorder %s4137_s4, %s4137_s4 }
  0x44   : > { %p3893_p5 = scmp.lt.s32.totalorder %s3891_s30, %s3884_s28 }
  0x45   : > { %p3887_p13 = pnand %p3885_p11, %p3845_p12 }
  0x46   : > { %p3894_p7 = por %p3893_p5, %p3892_p3 }
  0x47   : > { %p3888_p0 = pneg %p3887_p13 }
  0x49   : > { %p3895_p9 = pnand %p3894_p7, %p3888_p0 }
  0x4b   : > { %3898 = shalt.err (!%p3895_p9)
}
  0x4c   : > { %3692 = dma.hbm_to_vmem [thread:$0]  (!%p4133_p10), %s4969_s2, 16, %s4137_s4, [#allocation6]  }
  0x4d   : > { %s29_s7 = sadd.s32 1, %s4023_s17  ;;  %s32_s8 = sadd.s32 1, %s4027_s18 }
  0x4e   : > { %p30_p12 = scmp.ge.s32.totalorder %s29_s7, 2  ;;  %s41_s29 = sadd.s32 1, %s4011_s14 }
  0x4f   : > { %p48_p1 = scmp.ne.s32.totalorder %s4011_s14, %s4007_s13  ;;  %p49_p2 = scmp.eq.s32.totalorder %s4031_s19, 0 }
  0x50   : > { %s4991_s7 = smov (%p30_p12, %s29_s7), 0  ;;  %s4993_s8 = smov (!%p30_p12, %s32_s8), %s4027_s18 }
  0x51   : > { %4970 = sst [smem:[#allocation13_spill]] %s4991_s7  ;;  %s37_s9 = ssub.s32 %s4023_s17, %s4991_s7 }
  0x52   : > { %p4201_p4 = por %p49_p2, %p48_p1  ;;  %p34_p10 = scmp.ge.s32.totalorder %s4993_s8, 2 }
  0x53   : > { %p4972_p6 = scmp.ne.s32.totalorder %s4963_s23, 0  ;;  %p3703_p11 = scmp.lt.s32.totalorder %s4031_s19, 4 }
  0x54   : > { %s172_s11 = sand.u32 1, %s4011_s14   ;;  %s4995_s8 = smov (%p34_p10, %s4993_s8), 0 }
  0x55   : > { %p4207_p8 = por %p4972_p6, %p48_p1  ;;  %4974 = sst [smem:[#allocation14_spill]] %s4995_s8 }
  0x56   : > { %s3667_s20 = smul.u32 124, %s172_s11  ;;  %s36_s28 = ssub.s32 %s4027_s18, %s4995_s8 }
  0x57   : > { %s3668_s30 = smul.u32 31, %s4023_s17  ;;  %s38_s5 = sor.u32 %s37_s9, %s36_s28 }
  0x58   : > { %p39_p13 = scmp.eq.s32.totalorder %s38_s5, 0  ;;  %s3669_s6 = smul.u32 62, %s4027_s18 }
  0x59   : > { %s176_s21 = scalar_lea.vmem [#allocation2], %s3667_s20  ;;  %p4221_p0 = pnand %p3703_p11, %p4201_p4 }
  0x5a   : > { %s185_s27 = sshll.u32 %s176_s21, 4  ;;  %s182_s2 = sadd.s32 %s3669_s6, %s3668_s30  ;;  %s4228_s27 = int_to_ptr.vmem [resolvable:$true] %s185_s27 }
  0x5b   : > { %s4226_s1 = scalar_select %p39_p13, %s4011_s14, %s41_s29  }
  0x5c   : > { %s2930_s7 = sshll.u32 %s182_s2, 6  ;;  %s4235_s21 = scalar_lea.sflag [#allocation3], %s172_s11 }
  0x5d   : > { %s4233_s9 = scalar_lea.hbm %s4946_s0, %s2930_s7  ;;  %p3901_p5 = pneg %p4221_p0 }
  0x5e   : > { %s3899_s10 = scalar_lea.hbm %s4233_s9, 1984  ;;  %s3904_s17 = scalar_lea.hbm %s4946_s0, 7936 }
  0x5f   : > { %p3900_p3 = scmp.ne.s32.totalorder %s4233_s9, %s3899_s10  ;;  %p3905_p12 = scmp.lt.u32.totalorder %s4233_s9, %s4946_s0 }
  0x60   : > { %p3906_p1 = scmp.lt.u32.totalorder %s3904_s17, %s3899_s10  ;;  %p3908_p4 = scmp.lt.u32.totalorder %s3899_s10, %s4233_s9 }
  0x61   : > { %p3902_p7 = pnand %p3901_p5, %p3900_p3 }
  0x62   : > { %p3907_p2 = por %p3906_p1, %p3905_p12 }
  0x63   : > { %p3903_p9 = pneg %p3902_p7 }
  0x64   : > { %p3909_p10 = por %p3908_p4, %p3907_p2 }
  0x66   : > { %p3910_p6 = pnand %p3909_p10, %p3903_p9 }
  0x68   : > { %3913 = shalt.err (!%p3910_p6)
}
  0x69   : > { %s3914_s11 = scalar_lea.vmem %s4228_s27, 1984  ;;  %s4037_s20 = smov [#allocation2]  }
  0x6a   : > { %p3915_p11 = scmp.ne.s32.totalorder %s4228_s27, %s3914_s11  ;;  %s3919_s28 = sshll.u32 %s4037_s20, 4  ;;  %s3920_s28 = int_to_ptr.vmem [resolvable:$false] %s3919_s28 }
  0x6b   : > { %s3921_s30 = scalar_lea.vmem %s3920_s28, 3968  ;;  %p3922_p7 = scmp.lt.s32.totalorder %s4228_s27, %s3920_s28 }
  0x6c   : > { %p3917_p13 = pnand %p3915_p11, %p3901_p5  ;;  %p3923_p12 = scmp.lt.s32.totalorder %s3921_s30, %s3914_s11 }
  0x6e   : > { %p3918_p3 = pneg %p3917_p13  ;;  %p3924_p1 = por %p3923_p12, %p3922_p7 }
  0x70   : > { %p3925_p2 = pnand %p3924_p1, %p3918_p3 }
  0x72   : > { %3928 = shalt.err (!%p3925_p2)
}
  0x73   : > { %s4976_s5 = smov 4   ;;  %s4977_s6 = smov 64  }
  0x74   : > { %3696 = dma.hbm_to_vmem [thread:$0]  (!%p4221_p0), %s4233_s9, 1984, %s4228_s27, %s4235_s21, %s4977_s6, %s4977_s6, %s4976_s5  }
  0x75   : > { %p4978_p5 = scmp.ne.s32.totalorder %s4966_s26, 0 }
  0x76   : > { %s4269_s10 = sand.u32 (!%p4978_p5), 1, %s4007_s13   ;;  %p4979_p9 = scmp.ne.s32.totalorder (!%p4978_p5), %s4964_s24, 0 }
  0x77   : > { %197 = sbr.rel (%p4978_p5) target bundleno = 587 (0x24b), region = 32  ;;  %s200_s29 = scalar_lea.sflag (!%p4978_p5), [#allocation3], %s4269_s10 }
  0x78   : > { %s3670_s2 = smul.u32 (!%p4978_p5), 124, %s4269_s10 }
  0x7a   : > { %s4273_s17 = scalar_lea.vmem (!%p4978_p5), [#allocation2], %s3670_s2 }
  0x7e   : > { %3990 = dma.done.wait (%p4979_p9), %s200_s29, 1984  }
  0x7f   : > { %3992 = vsyncadd (%p4979_p9), %s200_s29, 4294965312  ;;  %p4980_p0 = scmp.ne.s32.totalorder %s4962_s22, 0 }
  0x81   : > { %3994 = dma.done.wait (%p4980_p0), [#allocation6], 592  }
  0x82   : > { %3996 = vsyncadd (%p4980_p0), [#allocation6], 4294966704  ;;  %vm464_vm0 = vcmask 1043456   ;;  %vm326_vm1 = vsmask.f32 7424  ;;  %v4302_v7 = vld [vmem:[%s4273_s17 + $0x8] sm:$0xff]  }
  0x83   : > { %v262_v0 = vld [vmem:[#allocation5 + $0x4] sm:$0xf]  ;;  %v4283_v1 = vld [vmem:[#allocation5 + $0x10] sm:$0xf]  ;;  %v4295_v5 = vld [vmem:[%s4273_s17 + $0x4] sm:$0xf] }
  0x84   : > { %v235_v2 = vld [vmem:[%s4273_s17] sm:$0xf]  ;;  %3657 = vmatprep.subr.msk.bf16.mxu1 %vm464_vm0, %v262_v0  ;;  %3661 = vmatprep.subr.msk.bf16.mxu0 %vm464_vm0, %v4283_v1  ;;  %v466_v3 = vsel %vm464_vm0, %v262_v0, 0  ;;  %v4292_v4 = vsel %vm464_vm0, %v4283_v1, 0  ;;  %vm427_vm2 = vcmask 64512   ;;  %v335_v13 = vshll.u32 %v4302_v7, 16 }
  0x85   : > { %3230 = vmatpush3.bf16.msra.mxu1 %v466_v3  ;;  %3334 = vmatpush3.bf16.msra.mxu0 %v4292_v4  ;;  %v4299_v6 = vcombine.low %v235_v2, %v4295_v5  ;;  %v259_v8 = vld [vmem:[#allocation5] sm:$0xf]  ;;  %v1255_v9 = vld [vmem:[%s4273_s17 + $0xc] sm:$0xf]  ;;  %v4307_v10 = vld [vmem:[%s4273_s17 + $0x10] sm:$0xf] }
  0x86   : > { %3658 = vmatprep.subr.msk.bf16.mxu1 %vm464_vm0, %v259_v8  ;;  %v339_v14 = vshrl.u32 %v4302_v7, 16  ;;  %v3008_v15 = vcombine.low %v1255_v9, %v4307_v10  ;;  %v4315_v16 = vld [vmem:[%s4273_s17 + $0x14] sm:$0xff]   ;;  %v1639_v17 = vld [vmem:[#allocation5 + $0x14] sm:$0xf]  ;;  %v622_v18 = vsel %vm464_vm0, %v259_v8, 0  ;;  %v337_v20 = vrot.slane %v335_v13, 1 }
  0x87   : > { %v328_v11 = vshrl.u32 %v4299_v6, 16  ;;  %v330_v12 = vshll.u32 %v4299_v6, 16  ;;  %3663 = vmatprep.subr.msk.bf16.mxu0 %vm464_vm0, %v1639_v17  ;;  %v4320_v21 = vld [vmem:[%s4273_s17 + $0x10] sm:$0xff]   ;;  %v4323_v22 = vld [vmem:[%s4273_s17 + $0x1c] sm:$0xff]   ;;  %v1353_v25 = vshll.u32 %v4315_v16, 16  ;;  %v1357_v26 = vshrl.u32 %v4315_v16, 16 }
  0x88   : > { %v1346_v23 = vshrl.u32 %v3008_v15, 16  ;;  %v1348_v24 = vshll.u32 %v3008_v15, 16  ;;  %v341_v28 = vor.u32 %v339_v14, %v337_v20  ;;  %v343_v29 = vshll.u32 %v4320_v21, 16  ;;  %v4331_v34 = vld [vmem:[%s4273_s17 + $0x18] sm:$0xff]   ;;  %v4336_v39 = vld [vmem:[%s4273_s17 + $0x24] sm:$0xff]   ;;  %v4348_v49 = vld [vmem:[%s4273_s17 + $0x2c] sm:$0xff]  }
  0x89   : > { %v332_v19 = vrot.slane %v330_v12, 1  ;;  %v1361_v30 = vshll.u32 %v4323_v22, 16  ;;  %v1355_v32 = vrot.slane %v1353_v25, 1  ;;  %v1705_v33 = vsel %vm464_vm0, %v1639_v17, 0  ;;  %v4344_v47 = vld [vmem:[%s4273_s17 + $0x20] sm:$0xff]   ;;  %v4354_v54 = vld [vmem:[%s4273_s17 + $0x28] sm:$0xff]  }
  0x8a   : > { %v1350_v31 = vrot.slane %v1348_v24, 1  ;;  %v345_v36 = vrot.slane %v343_v29, 1  ;;  %v347_v38 = vshrl.u32 %v4320_v21, 16  ;;  %v351_v42 = vshll.u32 %v4331_v34, 16  ;;  %v4367_v8 = vld [vmem:[%s4273_s17 + $0x34] sm:$0xff]   ;;  %s3671_s22 = smul.u32 192, %s4269_s10 }
  0x8b   : > { %v333_v27 = vor.u32 %v332_v19, %v328_v11  ;;  %v1363_v37 = vrot.slane %v1361_v30, 1  ;;  %v1359_v41 = vor.u32 %v1357_v26, %v1355_v32  ;;  %v1365_v43 = vshrl.u32 %v4323_v22, 16  ;;  %v4370_v9 = vld [vmem:[%s4273_s17 + $0x30] sm:$0xff]   ;;  %v4384_v25 = vld [vmem:[%s4273_s17 + $0x38] sm:$0xff]   ;;  %s3672_s26 = smul.u32 24, %s4015_s15  ;;  %s2800_s8 = scalar_lea.sflag [#allocation4], %s4269_s10 }
  0x8c   : > { %v1351_v40 = vor.u32 %v1350_v31, %v1346_v23  ;;  %v346_v44 = vsel %vm326_vm1, %v341_v28, %v345_v36  ;;  %v349_v45 = vor.u32 %v347_v38, %v345_v36  ;;  %v1369_v46 = vshll.u32 %v4336_v39, 16  ;;  %v1885_v38 = vld [vmem:[#allocation5 + $0x18] sm:$0xf]  ;;  %s4812_s24 = scalar_lea.vmem [#allocation8], %s3671_s22  ;;  %s3673_s27 = smul.u32 48, %s4019_s16 }
  0x8d   : > { %v338_v35 = vsel %vm326_vm1, %v333_v27, %v337_v20  ;;  %v355_v48 = vshrl.u32 %v4331_v34, 16  ;;  %v1364_v51 = vsel %vm326_vm1, %v1359_v41, %v1363_v37  ;;  %v353_v52 = vrot.slane %v351_v42, 1  ;;  %v4401_v42 = vld [vmem:[%s4273_s17 + $0x48] sm:$0xff]   ;;  %s2815_s23 = sshll.u32 %s4812_s24, 4  ;;  %s4038_s20 = smov [#allocation8]   ;;  %s4885_s23 = int_to_ptr.vmem [resolvable:$true] %s2815_s23 }
  0x8e   : > { %3231 = vmatprep.mubr.msk.bf16.mxu1 %vm427_vm2, %v338_v35  ;;  %v1356_v50 = vsel %vm326_vm1, %v1351_v40, %v1355_v32  ;;  %v1367_v53 = vor.u32 %v1365_v43, %v1363_v37  ;;  %v1371_v55 = vrot.slane %v1369_v46, 1  ;;  %v359_v56 = vshll.u32 %v4344_v47, 16  ;;  %v1637_v32 = vld [vmem:[%s4273_s17 + $0xc] sm:$0xe]  ;;  %s2812_s15 = sadd.s32 %s3673_s27, %s3672_s26  ;;  %s3929_s11 = scalar_lea.vmem %s4885_s23, 3072 }
  0x8f   : > { %3232 = vmatmul.mubr.msk.bf16.vlgmr.msra.gmra.mrb[0].mxu1 %vm427_vm2, %v346_v44  ;;  %3335 = vmatprep.mubr.msk.bf16.mxu0 %vm427_vm2, %v1356_v50  ;;  %v1373_v57 = vshrl.u32 %v4336_v39, 16  ;;  %v1377_v58 = vshll.u32 %v4348_v49, 16  ;;  %v354_v59 = vsel %vm326_vm1, %v349_v45, %v353_v52  ;;  %v357_v60 = vor.u32 %v355_v48, %v353_v52  ;;  %s3109_s16 = sshll.u32 %s2812_s15, 7  ;;  %p3930_p4 = scmp.ne.s32.totalorder %s4885_s23, %s3929_s11 }
  0x90   : > { %3256 = vmatpush3.bf16.msra.mxu1 %v622_v18  ;;  %3336 = vmatmul.mubr.msk.bf16.vlgmr.msra.gmra.mrb[0].mxu0 %vm427_vm2, %v1364_v51  ;;  %v363_v61 = vshrl.u32 %v4344_v47, 16  ;;  %v367_v62 = vshll.u32 %v4354_v54, 16  ;;  %v1372_v63 = vsel %vm326_vm1, %v1367_v53, %v1371_v55  ;;  %v361_v0 = vrot.slane %v359_v56, 1  ;;  %v4378_v18 = vld [vmem:[%s4273_s17 + $0x3c] sm:$0xff]   ;;  %s4883_s7 = scalar_lea.hbm %s4949_s3, %s3109_s16  ;;  %s3933_s28 = sshll.u32 %s4038_s20, 4  ;;  %s3934_s28 = int_to_ptr.vmem [resolvable:$false] %s3933_s28 }
  0x91   : > { %3360 = vmatpush3.bf16.msra.mxu0 %v1705_v33  ;;  %3235 = vmatprep.mubr.msk.bf16.mxu1 %vm427_vm2, %v354_v59  ;;  %v1375_v2 = vor.u32 %v1373_v57, %v1371_v55  ;;  %v1379_v3 = vrot.slane %v1377_v58, 1  ;;  %v1381_v12 = vshrl.u32 %v4348_v49, 16  ;;  %v1385_v17 = vshll.u32 %v4367_v8, 16  ;;  %v4393_v33 = vld [vmem:[%s4273_s17 + $0x40] sm:$0xff]   ;;  %v4418_v57 = vld [vmem:[%s4273_s17 + $0x50] sm:$0xff]   ;;  %p3931_p10 = pnand %p3930_p4, %p4207_p8  ;;  %s3935_s30 = scalar_lea.vmem %s3934_s28, 6144 }
  0x92   : > { %3339 = vmatprep.mubr.msk.bf16.mxu0 %vm427_vm2, %v1372_v63  ;;  %v369_v11 = vrot.slane %v367_v62, 1  ;;  %v362_v13 = vsel %vm326_vm1, %v357_v60, %v361_v0  ;;  %v365_v15 = vor.u32 %v363_v61, %v361_v0  ;;  %v371_v20 = vshrl.u32 %v4354_v54, 16  ;;  %3664 = vmatprep.subr.msk.bf16.mxu0 %vm464_vm0, %v1885_v38  ;;  %v4420_v58 = vld [vmem:[#allocation5 + $0x8] sm:$0xf]  ;;  %v4424_v60 = vld [vmem:[%s4273_s17 + $0x58] sm:$0xff]   ;;  %p3936_p11 = scmp.lt.s32.totalorder %s4885_s23, %s3934_s28  ;;  %p3937_p13 = scmp.lt.s32.totalorder %s3935_s30, %s3929_s11 }
  0x93   : > { %v1380_v14 = vsel %vm326_vm1, %v1375_v2, %v1379_v3  ;;  %v1383_v19 = vor.u32 %v1381_v12, %v1379_v3  ;;  %v375_v23 = vshll.u32 %v4370_v9, 16  ;;  %v1389_v24 = vshrl.u32 %v4367_v8, 16  ;;  %3659 = vmatprep.subr.msk.bf16.mxu1 %vm464_vm0, %v4420_v58  ;;  %p3932_p6 = pneg %p3931_p10 }
  0x94   : > { %v370_v26 = vsel %vm326_vm1, %v365_v15, %v369_v11  ;;  %v1387_v27 = vrot.slane %v1385_v17, 1  ;;  %v1393_v28 = vshll.u32 %v4378_v18, 16  ;;  %v379_v29 = vshrl.u32 %v4370_v9, 16  ;;  %p3938_p3 = por %p3937_p13, %p3936_p11 }
  0x95   : > { %v377_v30 = vrot.slane %v375_v23, 1  ;;  %v383_v31 = vshll.u32 %v4384_v25, 16  ;;  %v373_v36 = vor.u32 %v371_v20, %v369_v11  ;;  %v3033_v37 = vcombine.low %v1637_v32, %v4307_v10 }
  0x96   : > { %v1388_v35 = vsel %vm326_vm1, %v1383_v19, %v1387_v27  ;;  %v1391_v43 = vor.u32 %v1389_v24, %v1387_v27  ;;  %v4404_v44 = vrot.slane %v1393_v28, 1  ;;  %v1644_v45 = vrot.slane %v4315_v16, 1  ;;  %v4443_v19 = vld [vmem:[%s4273_s17 + $0x60] ss:$0 sps:$4 sm:$0x11]   ;;  %p3939_p7 = pnand %p3938_p3, %p3932_p6 }
  0x97   : > { %3236 = vmatmul.mubr.msk.bf16.gmra.mrb[4].mxu1 %vm427_vm2, %v362_v13  ;;  %v381_v40 = vor.u32 %v379_v29, %v377_v30  ;;  %v385_v41 = vrot.slane %v383_v31, 1  ;;  %v1643_v46 = vrot.slane %v3033_v37, 1  ;;  %v391_v10 = vshll.u32 %v4393_v33, 16 }
  0x98   : > { %3239 = vmatprep.mubr.msk.bf16.mxu1 %vm427_vm2, %v370_v26  ;;  %3340 = vmatmul.mubr.msk.bf16.gmra.mrb[4].mxu0 %vm427_vm2, %v1380_v14  ;;  %v378_v48 = vsel %vm326_vm1, %v373_v36, %v377_v30  ;;  %vm759_vm3 = vcmask 1046528   ;;  %v387_v50 = vshrl.u32 %v4384_v25, 16  ;;  %v395_v52 = vshrl.u32 %v4393_v33, 16  ;;  %v4447_v26 = vld [vmem:[#allocation5 + $0x1c] sm:$0xf] }
  0x99   : > { %3343 = vmatprep.mubr.msk.bf16.mxu0 %vm427_vm2, %v1388_v35  ;;  %v386_v51 = vsel %vm326_vm1, %v381_v40, %v385_v41  ;;  %v399_v53 = vshll.u32 %v4401_v42, 16  ;;  %v1396_v55 = vsel %vm326_vm1, %v1391_v43, %v4404_v44  ;;  %v1645_v16 = vsel %vm759_vm3, %v1643_v46, %v1644_v45  ;;  %v753_v35 = vld [vmem:[%s4273_s17] sm:$0xe] }
  0x9a   : > { %v393_v56 = vrot.slane %v391_v10, 1  ;;  %v389_v59 = vor.u32 %v387_v50, %v385_v41  ;;  %v1646_v63 = vrot.slane %v4323_v22, 1  ;;  %v1648_v0 = vrot.slane %v4336_v39, 1 }
  0x9b   : > { %v401_v62 = vrot.slane %v399_v53, 1  ;;  %v407_v2 = vshll.u32 %v4418_v57, 16  ;;  %v403_v11 = vshrl.u32 %v4401_v42, 16  ;;  %v415_v12 = vshll.u32 %v4424_v60, 16 }
  0x9c   : > { %v397_v61 = vor.u32 %v395_v52, %v393_v56  ;;  %v394_v3 = vsel %vm326_vm1, %v389_v59, %v393_v56  ;;  %v411_v14 = vshrl.u32 %v4418_v57, 16  ;;  %v1647_v15 = vsel %vm759_vm3, %v1644_v45, %v1646_v63  ;;  %v4473_v45 = vld [vmem:[%s4273_s17 + $0x44] sm:$0xff]  }
  0x9d   : > { %v1983_v17 = vsel %vm464_vm0, %v1885_v38, 0  ;;  %v1649_v22 = vsel %vm759_vm3, %v1646_v63, %v1648_v0  ;;  %v409_v39 = vrot.slane %v407_v2, 1  ;;  %v405_v20 = vor.u32 %v403_v11, %v401_v62 }
  0x9e   : > { %v402_v13 = vsel %vm326_vm1, %v397_v61, %v401_v62  ;;  %v1650_v23 = vrot.slane %v4348_v49, 1  ;;  %v417_v24 = vrot.slane %v415_v12, 1  ;;  %v1652_v28 = vrot.slane %v4367_v8, 1  ;;  %v3800_v12 = vld [vmem:[%s4273_s17 + $0x54] sm:$0xff]  }
  0x9f   : > { %3240 = vmatmul.mubr.msk.bf16.gmra.mrb[8].mxu1 %vm427_vm2, %v378_v48  ;;  %v413_v27 = vor.u32 %v411_v14, %v409_v39  ;;  %v761_v29 = vrot.slane %v4302_v7, 1  ;;  %v419_v30 = vshrl.u32 %v4424_v60, 16  ;;  %v763_v49 = vrot.slane %v4320_v21, 1 }
  0xa0   : > { %3243 = vmatprep.mubr.msk.bf16.mxu1 %vm427_vm2, %v386_v51  ;;  %3344 = vmatmul.mubr.msk.bf16.gmra.mrb[8].mxu0 %vm427_vm2, %v1396_v55  ;;  %v410_v31 = vsel %vm326_vm1, %v405_v20, %v409_v39  ;;  %v423_v32 = vshll.u32 %v4443_v19, 16  ;;  %v765_v36 = vrot.slane %v4331_v34, 1  ;;  %v2971_v8 = vcombine.low %v753_v35, %v4295_v5  ;;  %v4519_v20 = vld [vmem:[#allocation5 + $0xc] sm:$0xf] }
  0xa1   : > { %3361 = vmatprep.mubr.msk.bf16.mxu0 %vm427_vm2, %v1645_v16  ;;  %v418_v37 = vsel %vm326_vm1, %v413_v27, %v417_v24  ;;  %v4464_v38 = vsel %vm759_vm3, %v761_v29, %v763_v49  ;;  %v1651_v40 = vsel %vm759_vm3, %v1648_v0, %v1650_v23  ;;  %v1653_v43 = vsel %vm759_vm3, %v1650_v23, %v1652_v28  ;;  %v3802_v23 = vld [vmem:[%s4273_s17 + $0x64] sm:$0xff]   ;;  %v3803_v27 = vld [vmem:[%s4273_s17 + $0x6c] ss:$0 sps:$4 sm:$0x11]  }
  0xa2   : > { %v4468_v41 = vsel %vm759_vm3, %v763_v49, %v765_v36  ;;  %v760_v46 = vrot.slane %v2971_v8, 1  ;;  %v421_v10 = vor.u32 %v419_v30, %v417_v24  ;;  %v425_v48 = vrot.slane %v423_v32, 1  ;;  %v3804_v30 = vld [vmem:[%s4273_s17 + $0x18] sm:$0xff]   ;;  %v3805_v8 = vld [vmem:[%s4273_s17 + $0x20] sm:$0xff]  }
  0xa3   : > { %v767_v5 = vrot.slane %v4344_v47, 1  ;;  %v769_v51 = vrot.slane %v4354_v54, 1  ;;  %v1654_v52 = vrot.slane %v4378_v18, 1  ;;  %v771_v55 = vrot.slane %v4370_v9, 1 }
  0xa4   : > { %v4479_v50 = vsel %vm759_vm3, %v760_v46, %v761_v29  ;;  %v1656_v16 = vrot.slane %v4473_v45, 1  ;;  %v773_v59 = vrot.slane %v4384_v25, 1  ;;  %v426_v61 = vsel %vm326_vm1, %v421_v10, %v425_v48 }
  0xa5   : > { %v4485_v53 = vsel %vm759_vm3, %v765_v36, %v767_v5  ;;  %v4490_v56 = vsel %vm759_vm3, %v767_v5, %v769_v51  ;;  %v4495_v62 = vsel %vm759_vm3, %v769_v51, %v771_v55  ;;  %v775_v63 = vrot.slane %v4393_v33, 1  ;;  %v4566_v5 = vld [vmem:[#allocation5 + $0x20] sm:$0xf] }
  0xa6   : > { %v4499_v0 = vsel %vm759_vm3, %v771_v55, %v773_v59  ;;  %v1655_v2 = vsel %vm759_vm3, %v1652_v28, %v1654_v52  ;;  %v1657_v11 = vsel %vm759_vm3, %v1654_v52, %v1656_v16  ;;  %v1664_v24 = vrot.slane %v3802_v23, 1 }
  0xa7   : > { %3244 = vmatmul.mubr.msk.bf16.gmra.mrb[12].mxu1 %vm427_vm2, %v394_v3  ;;  %v3799_v3 = vld [vmem:[%s4273_s17 + $0x4c] sm:$0xff]   ;;  %v1405_v49 = vshrl.u32 %v4473_v45, 16  ;;  %v1421_v10 = vshrl.u32 %v3800_v12, 16  ;;  %vm2774_vm4 = vcmask 130048  }
  0xa8   : > { %3247 = vmatprep.mubr.msk.bf16.mxu1 %vm427_vm2, %v402_v13  ;;  %3362 = vmatmul.mubr.msk.bf16.vlgmr.msra.gmra.mrb[0].mxu0 %vm427_vm2, %v1647_v15  ;;  %v4509_v13 = vsel %vm759_vm3, %v773_v59, %v775_v63  ;;  %v1658_v14 = vrot.slane %v3799_v3, 1  ;;  %v1660_v15 = vrot.slane %v3800_v12, 1  ;;  %v1437_v59 = vshrl.u32 %v3802_v23, 16 }
  0xa9   : > { %3386 = vmatpush3.bf16.msra.mxu0 %v1983_v17  ;;  %3365 = vmatprep.mubr.msk.bf16.mxu0 %vm427_vm2, %v1649_v22  ;;  %v822_v17 = vsel %vm464_vm0, %v4420_v58, 0  ;;  %v3801_v22 = vld [vmem:[%s4273_s17 + $0x5c] sm:$0xff]  }
  0xaa   : > { %3665 = vmatprep.subr.msk.bf16.mxu0 %vm464_vm0, %v4447_v26  ;;  %v1659_v39 = vsel %vm759_vm3, %v1656_v16, %v1658_v14  ;;  %v1662_v58 = vrot.slane %v3801_v22, 1  ;;  %v1425_v48 = vshll.u32 %v3801_v22, 16  ;;  %v1433_v16 = vshll.u32 %v3802_v23, 16  ;;  %v2138_v23 = vld [vmem:[%s4273_s17 + $0x18] sm:$0xf] }
  0xac   : > { %v1665_v28 = vsel %vm759_vm3, %v1662_v58, %v1664_v24  ;;  %v1427_v55 = vrot.slane %v1425_v48, 1  ;;  %v2588_v48 = vsel %vm464_vm0, %v4566_v5, 0 }
  0xaf   : > { %3248 = vmatmul.mubr.msk.bf16.gmra.mrb[16].mxu1 %vm427_vm2, %v410_v31  ;;  %v1409_v31 = vshll.u32 %v3799_v3, 16 }
  0xb0   : > { %3251 = vmatprep.mubr.msk.bf16.mxu1 %vm427_vm2, %v418_v37  ;;  %3366 = vmatmul.mubr.msk.bf16.gmra.mrb[4].mxu0 %vm427_vm2, %v1651_v40  ;;  %v1417_v37 = vshll.u32 %v3800_v12, 16  ;;  %v3807_v12 = vld [vmem:[%s4273_s17 + $0x30] sm:$0xff]  }
  0xb1   : > { %3369 = vmatprep.mubr.msk.bf16.mxu0 %vm427_vm2, %v1653_v43  ;;  %v1411_v36 = vrot.slane %v1409_v31, 1  ;;  %v3806_v43 = vld [vmem:[%s4273_s17 + $0x28] sm:$0xff]   ;;  %v3816_v31 = vld [vmem:[%s4273_s17 + $0x70] sm:$0xff]  }
  0xb2   : > { %v1419_v46 = vrot.slane %v1417_v37, 1  ;;  %v777_v37 = vrot.slane %v4401_v42, 1 }
  0xb4   : > { %v1423_v52 = vor.u32 %v1421_v10, %v1419_v46 }
  0xb7   : > { %3252 = vmatmul.mubr.msk.bf16.gmra.mrb[20].mxu1 %vm427_vm2, %v426_v61  ;;  %v1441_v61 = vshll.u32 %v3803_v27, 16 }
  0xb8   : > { %3257 = vmatprep.mubr.msk.bf16.mxu1 %vm427_vm2, %v4299_v6  ;;  %3370 = vmatmul.mubr.msk.bf16.gmra.mrb[8].mxu0 %vm427_vm2, %v1655_v2  ;;  %v1661_v6 = vsel %vm759_vm3, %v1658_v14, %v1660_v15 }
  0xb9   : > { %3373 = vmatprep.mubr.msk.bf16.mxu0 %vm427_vm2, %v1657_v11  ;;  %v1443_v11 = vrot.slane %v1441_v61, 1  ;;  %v4676_v61 = vld [vmem:[%s4273_s17 + $0x50] sm:$0xff]  }
  0xbf   : > { %3258 = vmatmul.mubr.msk.bf16.vlgmr.msra.gmra.mrb[0].mxu1 %vm427_vm2, %v4302_v7  ;;  %v1663_v7 = vsel %vm759_vm3, %v1660_v15, %v1662_v58  ;;  %v4602_v58 = vld [vmem:[%s4273_s17 + $0x1c] sm:$0xf] }
  0xc0   : > { %3282 = vmatpush3.bf16.msra.mxu1 %v822_v17  ;;  %3261 = vmatprep.mubr.msk.bf16.mxu1 %vm427_vm2, %v4320_v21  ;;  %v1666_v21 = vrot.slane %v3803_v27, 1  ;;  %v3808_v17 = vld [vmem:[%s4273_s17 + $0x38] sm:$0xff]   ;;  %v3812_v27 = vld [vmem:[%s4273_s17 + $0x50] sm:$0xff]  }
  0xc1   : > { %3374 = vmatmul.mubr.msk.bf16.gmra.mrb[12].mxu0 %vm427_vm2, %v1659_v39  ;;  %3660 = vmatprep.subr.msk.bf16.mxu1 %vm464_vm0, %v4519_v20  ;;  %v3809_v39 = vld [vmem:[%s4273_s17 + $0x40] sm:$0xff]  }
  0xc2   : > { %3377 = vmatprep.mubr.msk.bf16.mxu0 %vm427_vm2, %v1661_v6  ;;  %v1667_v29 = vsel %vm759_vm3, %v1664_v24, %v1666_v21  ;;  %v3811_v6 = vld [vmem:[%s4273_s17 + $0x48] sm:$0xff]   ;;  %v1100_v24 = vsel %vm464_vm0, %v4519_v20, 0 }
  0xc3   : > { %v3815_v21 = vld [vmem:[%s4273_s17 + $0x68] sm:$0xff]  }
  0xc7   : > { %3262 = vmatmul.mubr.msk.bf16.gmra.mrb[4].mxu1 %vm427_vm2, %v4331_v34  ;;  %v1397_v34 = vshrl.u32 %v4378_v18, 16 }
  0xc8   : > { %3265 = vmatprep.mubr.msk.bf16.mxu1 %vm427_vm2, %v4344_v47  ;;  %v1401_v47 = vshll.u32 %v4473_v45, 16 }
  0xc9   : > { %3378 = vmatmul.mubr.msk.bf16.gmra.mrb[16].mxu0 %vm427_vm2, %v1663_v7  ;;  %v1399_v32 = vor.u32 %v1397_v34, %v4404_v44  ;;  %v2365_v44 = vsel %vm464_vm0, %v4447_v26, 0  ;;  %v4574_v26 = vsel %vm326_vm1, %v1423_v52, %v1427_v55  ;;  %v3813_v7 = vld [vmem:[%s4273_s17 + $0x58] sm:$0xff]  }
  0xca   : > { %3381 = vmatprep.mubr.msk.bf16.mxu0 %vm427_vm2, %v1665_v28  ;;  %v1403_v35 = vrot.slane %v1401_v47, 1  ;;  %v3070_v28 = vcombine.low %v2138_v23, %v4602_v58  ;;  %v4691_v23 = vld [vmem:[%s4273_s17 + $0x58] sm:$0xff]  }
  0xcc   : > { %v1407_v40 = vor.u32 %v1405_v49, %v1403_v35  ;;  %v2231_v20 = vshll.u32 %v3070_v28, 16  ;;  %v4633_v49 = vld [vmem:[%s4273_s17 + $0x30] sm:$0xff]  }
  0xce   : > { %v4562_v45 = vsel %vm326_vm1, %v1407_v40, %v1411_v36 }
  0xcf   : > { %3266 = vmatmul.mubr.msk.bf16.gmra.mrb[8].mxu1 %vm427_vm2, %v4354_v54  ;;  %v1413_v54 = vshrl.u32 %v3799_v3, 16  ;;  %v1435_v3 = vrot.slane %v1433_v16, 1 }
  0xd0   : > { %3269 = vmatprep.mubr.msk.bf16.mxu1 %vm427_vm2, %v4370_v9  ;;  %v4554_v9 = vsel %vm326_vm1, %v1399_v32, %v1403_v35 }
  0xd1   : > { %3382 = vmatmul.mubr.msk.bf16.gmra.mrb[20].mxu0 %vm427_vm2, %v1667_v29  ;;  %v1415_v18 = vor.u32 %v1413_v54, %v1411_v36  ;;  %v1439_v15 = vor.u32 %v1437_v59, %v1435_v3  ;;  %v2229_v29 = vshrl.u32 %v3070_v28, 16  ;;  %v2252_v36 = vshll.u32 %v4633_v49, 16  ;;  %v4695_v28 = vld [vmem:[%s4273_s17 + $0x60] sm:$0xff]  }
  0xd2   : > { %3387 = vmatprep.mubr.msk.bf16.mxu0 %vm427_vm2, %v3804_v30  ;;  %v2233_v30 = vrot.slane %v2231_v20, 1 }
  0xd3   : > { %v4569_v51 = vsel %vm326_vm1, %v1415_v18, %v1419_v46  ;;  %v4652_v18 = vld [vmem:[%s4273_s17 + $0x40] sm:$0xff]   ;;  %v778_v46 = vsel %vm759_vm3, %v775_v63, %v777_v37  ;;  %v779_v63 = vrot.slane %v4418_v57, 1 }
  0xd4   : > { %v2234_v34 = vor.u32 %v2233_v30, %v2229_v29  ;;  %v2288_v29 = vshrl.u32 %v4676_v61, 16 }
  0xd7   : > { %3270 = vmatmul.mubr.msk.bf16.gmra.mrb[12].mxu1 %vm427_vm2, %v4384_v25  ;;  %v1429_v25 = vshrl.u32 %v3801_v22, 16  ;;  %v4586_v22 = vsel %vm326_vm1, %v1439_v15, %v1443_v11  ;;  %v2272_v11 = vshrl.u32 %v4652_v18, 16 }
  0xd8   : > { %3273 = vmatprep.mubr.msk.bf16.mxu1 %vm427_vm2, %v4393_v33  ;;  %v2268_v33 = vshll.u32 %v4652_v18, 16 }
  0xd9   : > { %3388 = vmatmul.mubr.msk.bf16.vlgmr.msra.gmra.mrb[0].mxu0 %vm427_vm2, %v3805_v8  ;;  %v1431_v2 = vor.u32 %v1429_v25, %v1427_v55  ;;  %v4648_v8 = vld [vmem:[%s4273_s17 + $0x38] sm:$0xff]   ;;  %v781_v25 = vrot.slane %v4424_v60, 1 }
  0xda   : > { %3412 = vmatpush3.bf16.msra.mxu0 %v2365_v44  ;;  %3391 = vmatprep.mubr.msk.bf16.mxu0 %vm427_vm2, %v3806_v43  ;;  %v2254_v43 = vrot.slane %v2252_v36, 1  ;;  %v2264_v52 = vshrl.u32 %v4648_v8, 16  ;;  %v2270_v59 = vrot.slane %v2268_v33, 1  ;;  %v4714_v36 = vld [vmem:[%s4273_s17 + $0x70] sm:$0xff]  }
  0xdb   : > { %3666 = vmatprep.subr.msk.bf16.mxu0 %vm464_vm0, %v4566_v5  ;;  %v4580_v14 = vsel %vm326_vm1, %v1431_v2, %v1435_v3  ;;  %v780_v2 = vsel %vm759_vm3, %v777_v37, %v779_v63 }
  0xdf   : > { %3274 = vmatmul.mubr.msk.bf16.gmra.mrb[16].mxu1 %vm427_vm2, %v4401_v42  ;;  %v2256_v42 = vshrl.u32 %v4633_v49, 16 }
  0xe0   : > { %3277 = vmatprep.mubr.msk.bf16.mxu1 %vm427_vm2, %v4418_v57  ;;  %v782_v57 = vsel %vm759_vm3, %v779_v63, %v781_v25  ;;  %v3832_v63 = vld [vmem:[%s4273_s17 + $0x2c] sm:$0xff]  }
  0xe1   : > { %3392 = vmatmul.mubr.msk.bf16.gmra.mrb[4].mxu0 %vm427_vm2, %v3807_v12  ;;  %v2258_v5 = vor.u32 %v2256_v42, %v2254_v43 }
  0xe2   : > { %3395 = vmatprep.mubr.msk.bf16.mxu0 %vm427_vm2, %v3808_v17  ;;  %v2284_v17 = vshll.u32 %v4676_v61, 16 }
  0xe7   : > { %3278 = vmatmul.mubr.msk.bf16.gmra.mrb[20].mxu1 %vm427_vm2, %v4424_v60 }
  0xe8   : > { %3283 = vmatprep.mubr.msk.bf16.mxu1 %vm427_vm2, %v4479_v50  ;;  %v4618_v50 = vld [vmem:[%s4273_s17 + $0x20] sm:$0xff]  }
  0xe9   : > { %3396 = vmatmul.mubr.msk.bf16.gmra.mrb[8].mxu0 %vm427_vm2, %v3809_v39  ;;  %v2240_v32 = vshrl.u32 %v4618_v50, 16  ;;  %v783_v39 = vrot.slane %v4443_v19, 1 }
  0xea   : > { %3399 = vmatprep.mubr.msk.bf16.mxu0 %vm427_vm2, %v3811_v6 }
  0xeb   : > { %v784_v20 = vsel %vm759_vm3, %v781_v25, %v783_v39  ;;  %v3838_v39 = vld [vmem:[%s4273_s17 + $0x44] sm:$0xff]  }
  0xef   : > { %3284 = vmatmul.mubr.msk.bf16.vlgmr.msra.gmra.mrb[0].mxu1 %vm427_vm2, %v4464_v38  ;;  %v3814_v38 = vld [vmem:[%s4273_s17 + $0x60] sm:$0xff]  }
  0xf0   : > { %3308 = vmatpush3.bf16.msra.mxu1 %v1100_v24  ;;  %3287 = vmatprep.mubr.msk.bf16.mxu1 %vm427_vm2, %v4468_v41  ;;  %v2236_v41 = vshll.u32 %v4618_v50, 16  ;;  %v2274_v24 = vor.u32 %v2272_v11, %v2270_v59  ;;  %v2527_v11 = vrot.slane %v4618_v50, 1  ;;  %v2531_v50 = vrot.slane %v4633_v49, 1  ;;  %v3841_v49 = vld [vmem:[%s4273_s17 + $0x5c] sm:$0xff]  }
  0xf1   : > { %3400 = vmatmul.mubr.msk.bf16.gmra.mrb[12].mxu0 %vm427_vm2, %v3812_v27  ;;  %3662 = vmatprep.subr.msk.bf16.mxu1 %vm464_vm0, %v4283_v1  ;;  %v4629_v1 = vld [vmem:[%s4273_s17 + $0x28] sm:$0xff]  }
  0xf2   : > { %3403 = vmatprep.mubr.msk.bf16.mxu0 %vm427_vm2, %v3813_v7  ;;  %v2238_v47 = vrot.slane %v2236_v41, 1  ;;  %v2248_v35 = vshrl.u32 %v4629_v1, 16  ;;  %v2286_v7 = vrot.slane %v2284_v17, 1  ;;  %v2296_v41 = vshrl.u32 %v4691_v23, 16 }
  0xf3   : > { %v2529_v17 = vrot.slane %v4629_v1, 1 }
  0xf4   : > { %v2242_v40 = vor.u32 %v2240_v32, %v2238_v47  ;;  %v3826_v32 = vld [vmem:[%s4273_s17 + $0x14] sm:$0xff]  }
  0xf7   : > { %3288 = vmatmul.mubr.msk.bf16.gmra.mrb[4].mxu1 %vm427_vm2, %v4485_v53  ;;  %v2244_v53 = vshll.u32 %v4629_v1, 16  ;;  %v3840_v1 = vld [vmem:[%s4273_s17 + $0x54] sm:$0xff]  }
  0xf8   : > { %3291 = vmatprep.mubr.msk.bf16.mxu1 %vm427_vm2, %v4490_v56  ;;  %v2239_v56 = vsel %vm326_vm1, %v2234_v34, %v2238_v47  ;;  %v2300_v34 = vshll.u32 %v4695_v28, 16 }
  0xf9   : > { %3404 = vmatmul.mubr.msk.bf16.gmra.mrb[16].mxu0 %vm427_vm2, %v3814_v38  ;;  %v2246_v54 = vrot.slane %v2244_v53, 1  ;;  %v3824_v38 = vld [vmem:[%s4273_s17 + $0xc] sm:$0xff]   ;;  %v2290_v53 = vor.u32 %v2288_v29, %v2286_v7  ;;  %v3842_v29 = vld [vmem:[%s4273_s17 + $0x64] sm:$0xff]  }
  0xfa   : > { %3407 = vmatprep.mubr.msk.bf16.mxu0 %vm427_vm2, %v3815_v21  ;;  %v2292_v21 = vshll.u32 %v4691_v23, 16 }
  0xfb   : > { %v2247_v10 = vsel %vm326_vm1, %v2242_v40, %v2246_v54 }
  0xfc   : > { %v2294_v47 = vrot.slane %v2292_v21, 1 }
  0xfe   : > { %v2295_v40 = vsel %vm326_vm1, %v2290_v53, %v2294_v47 }
  0xff   : > { %3292 = vmatmul.mubr.msk.bf16.gmra.mrb[8].mxu1 %vm427_vm2, %v4495_v62  ;;  %v2250_v62 = vor.u32 %v2248_v35, %v2246_v54  ;;  %v2302_v35 = vrot.slane %v2300_v34, 1  ;;  %v3828_v54 = vld [vmem:[%s4273_s17 + $0x1c] sm:$0xff]  }
 0x100   : > { %3295 = vmatprep.mubr.msk.bf16.mxu1 %vm427_vm2, %v4499_v0  ;;  %v2260_v0 = vshll.u32 %v4648_v8, 16 }
 0x101   : > { %3408 = vmatmul.mubr.msk.bf16.gmra.mrb[20].mxu0 %vm427_vm2, %v3816_v31  ;;  %v2255_v44 = vsel %vm326_vm1, %v2250_v62, %v2254_v43  ;;  %v4709_v31 = vld [vmem:[%s4273_s17 + $0x68] sm:$0xff]   ;;  %v2304_v62 = vshrl.u32 %v4695_v28, 16 }
 0x102   : > { %3413 = vmatprep.mubr.msk.bf16.mxu0 %vm427_vm2, %v2239_v56  ;;  %v2262_v55 = vrot.slane %v2260_v0, 1  ;;  %v2298_v56 = vor.u32 %v2296_v41, %v2294_v47  ;;  %v2308_v37 = vshll.u32 %v4709_v31, 16  ;;  %v2316_v0 = vshll.u32 %v4714_v36, 16 }
 0x103   : > { %v2306_v42 = vor.u32 %v2304_v62, %v2302_v35  ;;  %v2541_v41 = vrot.slane %v4691_v23, 1  ;;  %v2547_v23 = vrot.slane %v4714_v36, 1 }
 0x104   : > { %v2266_v16 = vor.u32 %v2264_v52, %v2262_v55  ;;  %v2263_v60 = vsel %vm326_vm1, %v2258_v5, %v2262_v55  ;;  %v2303_v43 = vsel %vm326_vm1, %v2298_v56, %v2302_v35  ;;  %v2318_v33 = vrot.slane %v2316_v0, 1  ;;  %v2520_v55 = vld [vmem:[%s4273_s17 + $0x18] sm:$0xe] }
 0x106   : > { %v2271_v12 = vsel %vm326_vm1, %v2266_v16, %v2270_v59  ;;  %v3095_v59 = vcombine.low %v2520_v55, %v4602_v58 }
 0x107   : > { %3296 = vmatmul.mubr.msk.bf16.gmra.mrb[12].mxu1 %vm427_vm2, %v4509_v13  ;;  %v4672_v13 = vld [vmem:[%s4273_s17 + $0x48] sm:$0xff]  }
 0x108   : > { %3299 = vmatprep.mubr.msk.bf16.mxu1 %vm427_vm2, %v778_v46  ;;  %v2276_v3 = vshll.u32 %v4672_v13, 16  ;;  %v2280_v15 = vshrl.u32 %v4672_v13, 16  ;;  %v2312_v46 = vshrl.u32 %v4709_v31, 16 }
 0x109   : > { %3414 = vmatmul.mubr.msk.bf16.vlgmr.msra.gmra.mrb[0].mxu0 %vm427_vm2, %v2247_v10  ;;  %v2310_v10 = vrot.slane %v2308_v37, 1 }
 0x10a   : > { %3438 = vmatpush3.bf16.msra.mxu0 %v2588_v48  ;;  %3417 = vmatprep.mubr.msk.bf16.mxu0 %vm427_vm2, %v2255_v44  ;;  %v2278_v6 = vrot.slane %v2276_v3, 1  ;;  %v4729_v48 = vld [vmem:[%s4273_s17 + $0x78] ss:$0 sps:$4 sm:$0x11]   ;;  %v3830_v44 = vld [vmem:[%s4273_s17 + $0x24] sm:$0xff]  }
 0x10b   : > { %v2314_v52 = vor.u32 %v2312_v46, %v2310_v10  ;;  %v2311_v25 = vsel %vm326_vm1, %v2306_v42, %v2310_v10  ;;  %v2324_v5 = vshll.u32 %v4729_v48, 16  ;;  %v3834_v3 = vld [vmem:[%s4273_s17 + $0x34] sm:$0xff]   ;;  %v4808_v46 = vld [vmem:[#allocation7] ss:$0 sm:$0xff] }
 0x10c   : > { %v2282_v27 = vor.u32 %v2280_v15, %v2278_v6  ;;  %v2279_v19 = vsel %vm326_vm1, %v2274_v24, %v2278_v6  ;;  %v3839_v6 = vld [vmem:[%s4273_s17 + $0x4c] sm:$0xff]   ;;  %v2530_v24 = vsel %vm759_vm3, %v2527_v11, %v2529_v17 }
 0x10d   : > { %v2319_v16 = vsel %vm326_vm1, %v2314_v52, %v2318_v33 }
 0x10e   : > { %v2287_v30 = vsel %vm326_vm1, %v2282_v27, %v2286_v7  ;;  %v2532_v27 = vsel %vm759_vm3, %v2529_v17, %v2531_v50  ;;  %v2533_v7 = vrot.slane %v4648_v8, 1  ;;  %v2539_v8 = vrot.slane %v4676_v61, 1 }
 0x10f   : > { %3300 = vmatmul.mubr.msk.bf16.gmra.mrb[16].mxu1 %vm427_vm2, %v780_v2 }
 0x110   : > { %3303 = vmatprep.mubr.msk.bf16.mxu1 %vm427_vm2, %v782_v57  ;;  %v2326_v57 = vrot.slane %v2324_v5, 1  ;;  %v2542_v34 = vsel %vm759_vm3, %v2539_v8, %v2541_v41 }
 0x111   : > { %3418 = vmatmul.mubr.msk.bf16.gmra.mrb[4].mxu0 %vm427_vm2, %v2263_v60  ;;  %v2526_v60 = vrot.slane %v3095_v59, 1 }
 0x112   : > { %3421 = vmatprep.mubr.msk.bf16.mxu0 %vm427_vm2, %v2271_v12  ;;  %v3836_v12 = vld [vmem:[%s4273_s17 + $0x3c] sm:$0xff]  }
 0x113   : > { %v2528_v58 = vsel %vm759_vm3, %v2526_v60, %v2527_v11 }
 0x117   : > { %3304 = vmatmul.mubr.msk.bf16.gmra.mrb[20].mxu1 %vm427_vm2, %v784_v20  ;;  %v2535_v20 = vrot.slane %v4652_v18, 1 }
 0x118   : > { %3309 = vmatprep.mubr.msk.bf16.mxu1 %vm427_vm2, %v3824_v38  ;;  %v2534_v38 = vsel %vm759_vm3, %v2531_v50, %v2533_v7 }
 0x119   : > { %3422 = vmatmul.mubr.msk.bf16.gmra.mrb[8].mxu0 %vm427_vm2, %v2279_v19  ;;  %v2536_v21 = vsel %vm759_vm3, %v2533_v7, %v2535_v20  ;;  %v2537_v19 = vrot.slane %v4672_v13, 1  ;;  %v2543_v13 = vrot.slane %v4695_v28, 1 }
 0x11a   : > { %3425 = vmatprep.mubr.msk.bf16.mxu0 %vm427_vm2, %v2287_v30 }
 0x11b   : > { %v2538_v18 = vsel %vm759_vm3, %v2535_v20, %v2537_v19  ;;  %v2540_v30 = vsel %vm759_vm3, %v2537_v19, %v2539_v8  ;;  %v2544_v61 = vsel %vm759_vm3, %v2541_v41, %v2543_v13 }
 0x11f   : > { %3310 = vmatmul.mubr.msk.bf16.vlgmr.msra.gmra.mrb[0].mxu1 %vm427_vm2, %v3826_v32 }
 0x120   : > { %3464 = vmatpush3.bf16.msra.mxu1 %v4292_v4  ;;  %3313 = vmatprep.mubr.msk.bf16.mxu1 %vm427_vm2, %v3828_v54  ;;  %v2320_v4 = vshrl.u32 %v4714_v36, 16 }
 0x121   : > { %3426 = vmatmul.mubr.msk.bf16.gmra.mrb[12].mxu0 %vm427_vm2, %v2295_v40 }
 0x122   : > { %3429 = vmatprep.mubr.msk.bf16.mxu0 %vm427_vm2, %v2303_v43  ;;  %v2322_v2 = vor.u32 %v2320_v4, %v2318_v33 }
 0x124   : > { %v2327_v15 = vsel %vm326_vm1, %v2322_v2, %v2326_v57 }
 0x127   : > { %3314 = vmatmul.mubr.msk.bf16.gmra.mrb[4].mxu1 %vm427_vm2, %v3830_v44 }
 0x128   : > { %3317 = vmatprep.mubr.msk.bf16.mxu1 %vm427_vm2, %v3832_v63 }
 0x129   : > { %3430 = vmatmul.mubr.msk.bf16.gmra.mrb[16].mxu0 %vm427_vm2, %v2311_v25 }
 0x12a   : > { %3433 = vmatprep.mubr.msk.bf16.mxu0 %vm427_vm2, %v2319_v16 }
 0x12f   : > { %3318 = vmatmul.mubr.msk.bf16.gmra.mrb[8].mxu1 %vm427_vm2, %v3834_v3 }
 0x130   : > { %3321 = vmatprep.mubr.msk.bf16.mxu1 %vm427_vm2, %v3836_v12 }
 0x131   : > { %3434 = vmatmul.mubr.msk.bf16.gmra.mrb[20].mxu0 %vm427_vm2, %v2327_v15 }
 0x132   : > { %3439 = vmatprep.mubr.msk.bf16.mxu0 %vm427_vm2, %v2528_v58 }
 0x137   : > { %3322 = vmatmul.mubr.msk.bf16.gmra.mrb[12].mxu1 %vm427_vm2, %v3838_v39 }
 0x138   : > { %3325 = vmatprep.mubr.msk.bf16.mxu1 %vm427_vm2, %v3839_v6 }
 0x139   : > { %3440 = vmatmul.mubr.msk.bf16.vlgmr.msra.gmra.mrb[0].mxu0 %vm427_vm2, %v2530_v24 }
 0x13a   : > { %3443 = vmatprep.mubr.msk.bf16.mxu0 %vm427_vm2, %v2532_v27 }
 0x13f   : > { %3326 = vmatmul.mubr.msk.bf16.gmra.mrb[16].mxu1 %vm427_vm2, %v3840_v1 }
 0x140   : > { %3329 = vmatprep.mubr.msk.bf16.mxu1 %vm427_vm2, %v3841_v49 }
 0x141   : > { %3444 = vmatmul.mubr.msk.bf16.gmra.mrb[4].mxu0 %vm427_vm2, %v2534_v38 }
 0x142   : > { %3447 = vmatprep.mubr.msk.bf16.mxu0 %vm427_vm2, %v2536_v21 }
 0x147   : > { %3330 = vmatmul.mubr.msk.bf16.gmra.mrb[20].mxu1 %vm427_vm2, %v3842_v29 }
 0x148   : > { %3347 = vmatprep.mubr.msk.bf16.mxu1 %vm427_vm2, %v4554_v9  ;;  %v2545_v9 = vrot.slane %v4709_v31, 1 }
 0x149   : > { %3448 = vmatmul.mubr.msk.bf16.gmra.mrb[8].mxu0 %vm427_vm2, %v2538_v18 }
 0x14a   : > { %3451 = vmatprep.mubr.msk.bf16.mxu0 %vm427_vm2, %v2540_v30  ;;  %v2546_v28 = vsel %vm759_vm3, %v2543_v13, %v2545_v9 }
 0x14f   : > { %3348 = vmatmul.mubr.msk.bf16.vlgmr.msra.gmra.mrb[12].mxu1 %vm427_vm2, %v4562_v45  ;;  %v2548_v45 = vsel %vm759_vm3, %v2545_v9, %v2547_v23 }
 0x150   : > { %3351 = vmatprep.mubr.msk.bf16.mxu1 %vm427_vm2, %v4569_v51  ;;  %v2549_v51 = vrot.slane %v4729_v48, 1 }
 0x151   : > { %3452 = vmatmul.mubr.msk.bf16.gmra.mrb[12].mxu0 %vm427_vm2, %v2542_v34 }
 0x152   : > { %3455 = vmatprep.mubr.msk.bf16.mxu0 %vm427_vm2, %v2544_v61  ;;  %v2550_v47 = vsel %vm759_vm3, %v2547_v23, %v2549_v51 }
 0x157   : > { %3352 = vmatmul.mubr.msk.bf16.gmra.mrb[16].mxu1 %vm427_vm2, %v4574_v26 }
 0x158   : > { %3355 = vmatprep.mubr.msk.bf16.mxu1 %vm427_vm2, %v4580_v14 }
 0x159   : > { %3456 = vmatmul.mubr.msk.bf16.gmra.mrb[16].mxu0 %vm427_vm2, %v2546_v28 }
 0x15a   : > { %3459 = vmatprep.mubr.msk.bf16.mxu0 %vm427_vm2, %v2548_v45 }
 0x15f   : > { %3356 = vmatmul.mubr.msk.bf16.gmra.mrb[20].mxu1 %vm427_vm2, %v4586_v22 }
 0x161   : > { %3460 = vmatmul.mubr.msk.bf16.gmra.mrb[20].mxu0 %vm427_vm2, %v2550_v47 }
 0x1f2   : > { %v3311_v26 = vpop.f32.mrb[0].mxu1 }
 0x1f3   : > { %v1136_v31 = vpop.f32.mrb[1].mxu1 }
 0x1f4   : > { %v3312_v53 = vpop.f32.mrb[2].mxu1 }
 0x1f5   : > { %v1139_v32 = vpop.f32.mrb[3].mxu1 }
 0x1fa   : > { %v3315_v56 = vpop.f32.mrb[4].mxu1 }
 0x1fb   : > { %v1152_v14 = vpop.f32.mrb[5].mxu1 }
 0x1fc   : > { %v3316_v35 = vpop.f32.mrb[6].mxu1 }
 0x1fd   : > { %v1155_v36 = vpop.f32.mrb[7].mxu1 }
 0x202   : > { %v3319_v54 = vpop.f32.mrb[8].mxu1 }
 0x203   : > { %v1168_v37 = vpop.f32.mrb[9].mxu1 }
 0x204   : > { %v3320_v40 = vpop.f32.mrb[10].mxu1 }
 0x205   : > { %v1171_v62 = vpop.f32.mrb[11].mxu1 }
 0x20c   : > { %v3441_v43 = vpop.f32.mrb[0].mxu0 }
 0x20d   : > { %v3465_v0 = vadd.f32 %v3441_v43, %v3311_v26  ;;  %v2624_v22 = vpop.f32.mrb[1].mxu0 }
 0x20e   : > { %v3466_v10 = vadd.f32 %v2624_v22, %v1136_v31  ;;  %v3442_v42 = vpop.f32.mrb[2].mxu0 }
 0x20f   : > { %v2752_v48 = vadd.f32 %v3465_v0, %v4808_v46  ;;  %v3467_v44 = vadd.f32 %v3442_v42, %v3312_v53  ;;  %v2627_v52 = vpop.f32.mrb[3].mxu0 }
 0x210   : > { %v2750_v33 = vadd.f32 %v3466_v10, %v4808_v46  ;;  %v3468_v63 = vadd.f32 %v2627_v52, %v1139_v32 }
 0x211   : > { %2777 = vst.msk [vmem:[%s4812_s24 + $0x10] sm:$0xff] %vm2774_vm4, %v2752_v48  ;;  %v2753_v55 = vadd.f32 %v3467_v44, %v4808_v46 }
 0x212   : > { %2775 = vst.msk [vmem:[%s4812_s24] sm:$0xff] %vm2774_vm4, %v2750_v33  ;;  %v2751_v25 = vadd.f32 %v3468_v63, %v4808_v46 }
 0x213   : > { %2778 = vst.msk [vmem:[%s4812_s24 + $0x18] sm:$0xff] %vm2774_vm4, %v2753_v55 }
 0x214   : > { %2776 = vst.msk [vmem:[%s4812_s24 + $0x8] sm:$0xff] %vm2774_vm4, %v2751_v25  ;;  %v3445_v4 = vpop.f32.mrb[4].mxu0 }
 0x215   : > { %v3469_v5 = vadd.f32 %v3445_v4, %v3315_v56  ;;  %v2640_v16 = vpop.f32.mrb[5].mxu0 }
 0x216   : > { %v3470_v59 = vadd.f32 %v2640_v16, %v1152_v14  ;;  %v3446_v2 = vpop.f32.mrb[6].mxu0 }
 0x217   : > { %v2756_v57 = vadd.f32 %v3469_v5, %v4808_v46  ;;  %v3471_v3 = vadd.f32 %v3446_v2, %v3316_v35  ;;  %v2643_v60 = vpop.f32.mrb[7].mxu0 }
 0x218   : > { %v2754_v11 = vadd.f32 %v3470_v59, %v4808_v46  ;;  %v3472_v12 = vadd.f32 %v2643_v60, %v1155_v36 }
 0x219   : > { %2781 = vst.msk [vmem:[%s4812_s24 + $0x30] sm:$0xff] %vm2774_vm4, %v2756_v57  ;;  %v2757_v15 = vadd.f32 %v3471_v3, %v4808_v46 }
 0x21a   : > { %2779 = vst.msk [vmem:[%s4812_s24 + $0x20] sm:$0xff] %vm2774_vm4, %v2754_v11  ;;  %v2755_v58 = vadd.f32 %v3472_v12, %v4808_v46 }
 0x21b   : > { %2782 = vst.msk [vmem:[%s4812_s24 + $0x38] sm:$0xff] %vm2774_vm4, %v2757_v15 }
 0x21c   : > { %2780 = vst.msk [vmem:[%s4812_s24 + $0x28] sm:$0xff] %vm2774_vm4, %v2755_v58  ;;  %v3449_v17 = vpop.f32.mrb[8].mxu0 }
 0x21d   : > { %v3473_v39 = vadd.f32 %v3449_v17, %v3319_v54  ;;  %v2656_v50 = vpop.f32.mrb[9].mxu0 }
 0x21e   : > { %v3474_v6 = vadd.f32 %v2656_v50, %v1168_v37  ;;  %v3450_v24 = vpop.f32.mrb[10].mxu0 }
 0x21f   : > { %v2760_v27 = vadd.f32 %v3473_v39, %v4808_v46  ;;  %v3475_v7 = vadd.f32 %v3450_v24, %v3320_v40  ;;  %v2659_v1 = vpop.f32.mrb[11].mxu0 }
 0x220   : > { %v2758_v20 = vadd.f32 %v3474_v6, %v4808_v46  ;;  %v3476_v49 = vadd.f32 %v2659_v1, %v1171_v62 }
 0x221   : > { %2785 = vst.msk [vmem:[%s4812_s24 + $0x50] sm:$0xff] %vm2774_vm4, %v2760_v27  ;;  %v2761_v38 = vadd.f32 %v3475_v7, %v4808_v46 }
 0x222   : > { %2783 = vst.msk [vmem:[%s4812_s24 + $0x40] sm:$0xff] %vm2774_vm4, %v2758_v20  ;;  %v2759_v21 = vadd.f32 %v3476_v49, %v4808_v46  ;;  %v3349_v19 = vpop.f32.mrb[12].mxu1 }
 0x223   : > { %2786 = vst.msk [vmem:[%s4812_s24 + $0x58] sm:$0xff] %vm2774_vm4, %v2761_v38  ;;  %v1566_v29 = vpop.f32.mrb[13].mxu1 }
 0x224   : > { %2784 = vst.msk [vmem:[%s4812_s24 + $0x48] sm:$0xff] %vm2774_vm4, %v2759_v21  ;;  %v3453_v8 = vpop.f32.mrb[12].mxu0  ;;  %v3350_v18 = vpop.f32.mrb[14].mxu1 }
 0x225   : > { %v3477_v30 = vadd.f32 %v3453_v8, %v3349_v19  ;;  %v2672_v41 = vpop.f32.mrb[13].mxu0  ;;  %v1569_v13 = vpop.f32.mrb[15].mxu1 }
 0x226   : > { %v3478_v34 = vadd.f32 %v2672_v41, %v1566_v29  ;;  %v3454_v61 = vpop.f32.mrb[14].mxu0 }
 0x227   : > { %v2764_v9 = vadd.f32 %v3477_v30, %v4808_v46  ;;  %v3479_v23 = vadd.f32 %v3454_v61, %v3350_v18  ;;  %v2675_v28 = vpop.f32.mrb[15].mxu0 }
 0x228   : > { %v2762_v45 = vadd.f32 %v3478_v34, %v4808_v46  ;;  %v3480_v51 = vadd.f32 %v2675_v28, %v1569_v13 }
 0x229   : > { %2789 = vst.msk [vmem:[%s4812_s24 + $0x70] sm:$0xff] %vm2774_vm4, %v2764_v9  ;;  %v2765_v47 = vadd.f32 %v3479_v23, %v4808_v46 }
 0x22a   : > { %2787 = vst.msk [vmem:[%s4812_s24 + $0x60] sm:$0xff] %vm2774_vm4, %v2762_v45  ;;  %v2763_v26 = vadd.f32 %v3480_v51, %v4808_v46  ;;  %v3353_v31 = vpop.f32.mrb[16].mxu1 }
 0x22b   : > { %2790 = vst.msk [vmem:[%s4812_s24 + $0x78] sm:$0xff] %vm2774_vm4, %v2765_v47  ;;  %v1582_v53 = vpop.f32.mrb[17].mxu1 }
 0x22c   : > { %2788 = vst.msk [vmem:[%s4812_s24 + $0x68] sm:$0xff] %vm2774_vm4, %v2763_v26  ;;  %v3457_v32 = vpop.f32.mrb[16].mxu0  ;;  %v3354_v56 = vpop.f32.mrb[18].mxu1 }
 0x22d   : > { %v3481_v14 = vadd.f32 %v3457_v32, %v3353_v31  ;;  %v2688_v35 = vpop.f32.mrb[17].mxu0  ;;  %v1585_v36 = vpop.f32.mrb[19].mxu1 }
 0x22e   : > { %v3482_v54 = vadd.f32 %v2688_v35, %v1582_v53  ;;  %v3458_v37 = vpop.f32.mrb[18].mxu0 }
 0x22f   : > { %v2768_v40 = vadd.f32 %v3481_v14, %v4808_v46  ;;  %v3483_v62 = vadd.f32 %v3458_v37, %v3354_v56  ;;  %v2691_v43 = vpop.f32.mrb[19].mxu0 }
 0x230   : > { %v2766_v0 = vadd.f32 %v3482_v54, %v4808_v46  ;;  %v3484_v22 = vadd.f32 %v2691_v43, %v1585_v36 }
 0x231   : > { %2793 = vst.msk [vmem:[%s4812_s24 + $0x90] sm:$0xff] %vm2774_vm4, %v2768_v40  ;;  %v2769_v10 = vadd.f32 %v3483_v62, %v4808_v46 }
 0x232   : > { %2791 = vst.msk [vmem:[%s4812_s24 + $0x80] sm:$0xff] %vm2774_vm4, %v2766_v0  ;;  %v2767_v42 = vadd.f32 %v3484_v22, %v4808_v46  ;;  %v3357_v48 = vpop.f32.mrb[20].mxu1 }
 0x233   : > { %2794 = vst.msk [vmem:[%s4812_s24 + $0x98] sm:$0xff] %vm2774_vm4, %v2769_v10  ;;  %v1598_v44 = vpop.f32.mrb[21].mxu1 }
 0x234   : > { %2792 = vst.msk [vmem:[%s4812_s24 + $0x88] sm:$0xff] %vm2774_vm4, %v2767_v42  ;;  %v3461_v52 = vpop.f32.mrb[20].mxu0  ;;  %v3358_v33 = vpop.f32.mrb[22].mxu1 }
 0x235   : > { %v3485_v63 = vadd.f32 %v3461_v52, %v3357_v48  ;;  %v2704_v55 = vpop.f32.mrb[21].mxu0  ;;  %v1601_v25 = vpop.f32.mrb[23].mxu1 }
 0x236   : > { %v3486_v4 = vadd.f32 %v2704_v55, %v1598_v44  ;;  %v3462_v5 = vpop.f32.mrb[22].mxu0 }
 0x237   : > { %v2772_v16 = vadd.f32 %v3485_v63, %v4808_v46  ;;  %v3487_v59 = vadd.f32 %v3462_v5, %v3358_v33  ;;  %v2707_v2 = vpop.f32.mrb[23].mxu0 }
 0x238   : > { %v2770_v57 = vadd.f32 %v3486_v4, %v4808_v46  ;;  %v3488_v3 = vadd.f32 %v2707_v2, %v1601_v25 }
 0x239   : > { %2797 = vst.msk [vmem:[%s4812_s24 + $0xb0] sm:$0xff] %vm2774_vm4, %v2772_v16  ;;  %v2773_v60 = vadd.f32 %v3487_v59, %v4808_v46 }
 0x23a   : > { %2795 = vst.msk [vmem:[%s4812_s24 + $0xa0] sm:$0xff] %vm2774_vm4, %v2770_v57  ;;  %v2771_v11 = vadd.f32 %v3488_v3, %v4808_v46 }
 0x23b   : > { %2798 = vst.msk [vmem:[%s4812_s24 + $0xb8] sm:$0xff] %vm2774_vm4, %v2773_v60 }
 0x23c   : > { %2796 = vst.msk [vmem:[%s4812_s24 + $0xa8] sm:$0xff] %vm2774_vm4, %v2771_v11 }
 0x23d   : > { %3942 = shalt.err (!%p3939_p7)
}
 0x23e   : > { %s3943_s5 = scalar_lea.hbm %s4883_s7, 3072  ;;  %s3947_s29 = scalar_lea.hbm %s4949_s3, 12288 }
 0x23f   : > { %p3944_p12 = scmp.ne.s32.totalorder %s4883_s7, %s3943_s5  ;;  %p3948_p5 = scmp.lt.u32.totalorder %s4883_s7, %s4949_s3 }
 0x240   : > { %p3949_p9 = scmp.lt.u32.totalorder %s3947_s29, %s3943_s5  ;;  %p3951_p4 = scmp.lt.u32.totalorder %s3943_s5, %s4883_s7 }
 0x241   : > { %p3945_p1 = pnand %p3944_p12, %p4207_p8 }
 0x242   : > { %p3950_p0 = por %p3949_p9, %p3948_p5 }
 0x243   : > { %p3946_p2 = pneg %p3945_p1 }
 0x244   : > { %p3952_p10 = por %p3951_p4, %p3950_p0 }
 0x246   : > { %p3953_p6 = pnand %p3952_p10, %p3946_p2 }
 0x248   : > { %3956 = shalt.err (!%p3953_p6)
}
 0x249   : > { %s4039_s24 = smov 128   ;;  %s4040_s26 = smov 8  }
 0x24a   : > { %3684 = dma.vmem_to_hbm [thread:$0]  (%p4207_p8), %s4885_s23, 3072, %s4883_s7, %s2800_s8, %s4039_s24, %s4039_s24, %s4040_s26  }
 0x24b PF: > { %p3706_p11 = scmp.ge.s32.totalorder %s4031_s19, 2  ;;  %s2830_s27 = sand.u32 1, %s4003_s12  }
 0x24c   : > { %p4981_p13 = scmp.ne.s32.totalorder %s4965_s25, 0  ;;  %s2831_s15 = scalar_lea.sflag [#allocation4], %s2830_s27 }
 0x24e   : > { %p3698_p3 = pnand %p3706_p11, %p4981_p13 }
 0x250   : > { %3998 = dma.done.wait (!%p3698_p3), %s2831_s15, 3072  }
 0x251   : > { %4000 = vsyncadd (!%p3698_p3), %s2831_s15, 4294964224  ;;  %s20_s19 = sadd.s32 1, %s4031_s19   ;;  %s4982_s15 = sld [smem:[#allocation12_spill]] }
 0x252   : > { %p17_p7 = scmp.ge.s32.totalorder %s20_s19, 6   ;;  %s4983_s17 = sld [smem:[#allocation13_spill]] }
 0x253   : > { %s4984_s4 = sld [smem:[#allocation14_spill]]  ;;  %s4985_s12 = smov %s4007_s13 }
 0x254   : > { %s4986_s13 = smov %s4011_s14  ;;  %s4987_s14 = smov %s4226_s1 }
 0x255   : > { %s4988_s16 = smov %s4027_s18  ;;  %19 = sbr.rel (!%p17_p7) target bundleno = 11 (0xb), region = 93 }
 0x259   : > { %s4989_s18 = smov %s4984_s4 }
 0x25c   :  { %2836 = vsyncpa [#allocation3], 1 }
 0x25d   :  { %2838 = vsyncpa [#allocation3 + $0x1], 1 }
 0x25e   :  { %2839 = vsyncpa [#allocation6], 1 }
 0x25f   :  { %2840 = vsyncpa [#allocation4], 1 }
 0x260   :  { %2842 = vsyncpa [#allocation4 + $0x1], 1 }

</bundles_post_ra>
